<compile_context>
chip_gen: v7x
topology: tpu7x:2x2x1
jax: 0.10.0
libtpu: 0.0.40
codegen_flags: <defaults>
</compile_context>

<pallas_src>
import jax
import jax.numpy as jnp
import numpy as np
from jax.experimental import pallas as pl
from jax.experimental.pallas import tpu as pltpu


# ------------------------------ fused kernel --------------------------------

def _net_kernel(x_ref, w1t_ref, b1_ref, w2t_ref, b2_ref,
                wf1_ref, bf1_ref, wf2_ref, bf2_ref, wf3_ref, bf3_ref,
                o_ref):
    """Whole Net forward for one sample, entirely in VMEM/registers.

    x_ref  : (1, 32, 32)  raw image (Cin == 1)
    w1t_ref: (96, 256)    conv1 row-Toeplitz weights; w-parity j occupies lane
                          block [j*128, j*128+90), inner order (pw1, c1)
    b1_ref : (1, 90)      conv1 bias tiled over pw1
    w2t_ref: (270, 256)   conv2 row-Toeplitz weights; lane blocks as above,
                          inner order (pw2, c2), 96 lanes used per block
    b2_ref : (1, 576)     conv2 bias tiled over (ph2, pw2)
    wf*/bf*:              fc weights packed as (in, out), zero-padded to 128
    o_ref  : (1, 1, 128)  fc3 logits (lanes 10..127 are exactly zero)
    """
    x = x_ref[0]                                                   # (32, 32)

    # ---- conv1 (3x3, 1->6) + ReLU + 2x2 max-pool ---------------------------
    # patch row for conv-output row ho: [x[ho], x[ho+1], x[ho+2]] along lanes.
    rows1 = jnp.concatenate([x[kh:kh + 30, :] for kh in range(3)], axis=1)
    y1 = jnp.dot(rows1, w1t_ref[...],
                 preferred_element_type=jnp.float32)               # (30, 256)
    # pool over w (the two 128-aligned lane blocks), then over h (adjacent
    # row pairs), then add bias and ReLU once.
    z1 = jnp.maximum(y1[:, 0:90], y1[:, 128:218])                  # (30, 90)
    a1 = jnp.concatenate(
        [jnp.maximum(z1[2 * p:2 * p + 1, :], z1[2 * p + 1:2 * p + 2, :])
         for p in range(15)], axis=0)                              # (15, 90)
    a1 = jnp.maximum(a1 + b1_ref[...], 0.0)        # rows=h1, lanes=pw1*6 + c1

    # ---- conv2 (3x3, 6->16) + ReLU + 2x2 max-pool --------------------------
    # only conv2 output rows 0..11 are needed (pool floor drops row/col 12).
    rows2 = jnp.concatenate([a1[kh:kh + 12, :] for kh in range(3)], axis=1)
    y2 = jnp.dot(rows2, w2t_ref[...],
                 preferred_element_type=jnp.float32)               # (12, 256)
    z2 = jnp.maximum(y2[:, 0:96], y2[:, 128:224])                  # (12, 96)
    # flatten directly while h-pooling: lane order = ph2*96 + pw2*16 + c2
    xflat = jnp.concatenate(
        [jnp.maximum(z2[2 * p:2 * p + 1, :], z2[2 * p + 1:2 * p + 2, :])
         for p in range(6)], axis=1)                               # (1, 576)
    xflat = jnp.maximum(xflat + b2_ref[...], 0.0)

    # ---- fc1 -> ReLU -> fc2 -> ReLU -> fc3 ---------------------------------
    h = jnp.maximum(
        jnp.dot(xflat, wf1_ref[...], preferred_element_type=jnp.float32)
        + bf1_ref[...], 0.0)
    h = jnp.maximum(
        jnp.dot(h, wf2_ref[...], preferred_element_type=jnp.float32)
        + bf2_ref[...], 0.0)
    o_ref[0] = (jnp.dot(h, wf3_ref[...], preferred_element_type=jnp.float32)
                + bf3_ref[...])


# -------------------------- one-time weight packing --------------------------

def pack_params(params):
    """Host-side, runs ONCE: Toeplitz-expand conv weights, permute fc1 columns
    to undo the NCHW flatten, zero-pad everything to lane-friendly widths."""
    w1 = np.asarray(params['conv1_w'], np.float32)   # (6, 1, 3, 3)
    b1 = np.asarray(params['conv1_b'], np.float32)
    w2 = np.asarray(params['conv2_w'], np.float32)   # (16, 6, 3, 3)
    b2 = np.asarray(params['conv2_b'], np.float32)
    f1w = np.asarray(params['fc1_w'], np.float32)    # (120, 576)
    f1b = np.asarray(params['fc1_b'], np.float32)
    f2w = np.asarray(params['fc2_w'], np.float32)    # (84, 120)
    f2b = np.asarray(params['fc2_b'], np.float32)
    f3w = np.asarray(params['fc3_w'], np.float32)    # (10, 84)
    f3b = np.asarray(params['fc3_b'], np.float32)

    # conv1: rows1[ho, kh*32 + w] @ w1t -> conv1_out(ho, wo=2*pw1+j, co)
    w1t = np.zeros((96, 256), np.float32)
    for kh in range(3):
        for j in range(2):
            for pw in range(15):
                for kw in range(3):
                    w = 2 * pw + j + kw
                    col = j * 128 + pw * 6
                    w1t[kh * 32 + w, col:col + 6] = w1[:, 0, kh, kw]
    b1r = np.tile(b1, 15).reshape(1, 90)

    # conv2: rows2[h2, kh*90 + pw1*6 + ci] @ w2t -> conv2_out(h2, 2*pw2+j, co)
    w2t = np.zeros((270, 256), np.float32)
    for kh in range(3):
        for j in range(2):
            for pw2 in range(6):
                for kw in range(3):
                    pw1 = 2 * pw2 + j + kw
                    col = j * 128 + pw2 * 16
                    for ci in range(6):
                        w2t[kh * 90 + pw1 * 6 + ci, col:col + 16] = \
                            w2[:, ci, kh, kw]
    b2r = np.tile(b2, 36).reshape(1, 576)

    # fc1: kernel feature order is (ph2, pw2, c2); torch's NCHW flatten is
    # (c2, ph2, pw2) -> permute fc1 columns at pack time.
    wf1 = np.zeros((576, 128), np.float32)
    for ph in range(6):
        for pw in range(6):
            for c in range(16):
                wf1[ph * 96 + pw * 16 + c, :120] = f1w[:, c * 36 + ph * 6 + pw]
    bf1 = np.zeros((1, 128), np.float32)
    bf1[0, :120] = f1b

    wf2 = np.zeros((128, 128), np.float32)
    wf2[:120, :84] = f2w.T
    bf2 = np.zeros((1, 128), np.float32)
    bf2[0, :84] = f2b

    wf3 = np.zeros((128, 128), np.float32)
    wf3[:84, :10] = f3w.T
    bf3 = np.zeros((1, 128), np.float32)
    bf3[0, :10] = f3b

    packed = dict(w1t=w1t, b1r=b1r, w2t=w2t, b2r=b2r,
                  wf1=wf1, bf1=bf1, wf2=wf2, bf2=bf2, wf3=wf3, bf3=bf3)
    return {k: jnp.asarray(v) for k, v in packed.items()}


# ------------------------------ forward wrapper ------------------------------

def net_forward(packed, x_nchw):
    """x_nchw: (N, 1, 32, 32) float32 -> (N, 10) logits."""
    N = x_nchw.shape[0]
    x = x_nchw.reshape(N, 32, 32).astype(jnp.float32)   # Cin == 1

    def full(shape):
        return pl.BlockSpec(shape, lambda n, _s=shape: (0,) * len(_s))

    out = pl.pallas_call(
        _net_kernel,
        out_shape=jax.ShapeDtypeStruct((N, 1, 128), jnp.float32),
        grid_spec=pltpu.PrefetchScalarGridSpec(
            num_scalar_prefetch=0,
            grid=(N,),
            in_specs=[
                pl.BlockSpec((1, 32, 32), lambda n: (n, 0, 0)),
                full((96, 256)), full((1, 90)),
                full((270, 256)), full((1, 576)),
                full((576, 128)), full((1, 128)),
                full((128, 128)), full((1, 128)),
                full((128, 128)), full((1, 128)),
            ],
            out_specs=pl.BlockSpec((1, 1, 128), lambda n: (n, 0, 0)),
        ),
        compiler_params=pltpu.CompilerParams(
            dimension_semantics=("parallel",)),
    )(x, packed['w1t'], packed['b1r'], packed['w2t'], packed['b2r'],
      packed['wf1'], packed['bf1'], packed['wf2'], packed['bf2'],
      packed['wf3'], packed['bf3'])
    # lane-dense all the way through the kernel; un-pad once at the very end
    return out.reshape(N, 128)[:, :10]


# --------------------------- reference & init --------------------------------

def net_reference(params, x_nchw):
    """Pure-jnp reference (same math, no Pallas)."""
    def crp(x, w, b, K=3):
        N, H, W, Cin = x.shape
        Cout = w.shape[0]
        Ho, Wo = H - K + 1, W - K + 1
        cols = []
        for kh in range(K):
            for kw in range(K):
                cols.append(x[:, kh:kh + Ho, kw:kw + Wo, :])
        patches = jnp.concatenate(cols, axis=-1)
        w2d = jnp.transpose(w, (2, 3, 1, 0)).reshape(K * K * Cin, Cout)
        y = jnp.maximum(jnp.einsum('nhwf,fc->nhwc', patches, w2d) + b, 0.0)
        Hp, Wp = Ho // 2, Wo // 2
        y = y[:, :2 * Hp, :2 * Wp, :].reshape(N, Hp, 2, Wp, 2, Cout)
        return y.max(axis=(2, 4))

    x = jnp.transpose(x_nchw, (0, 2, 3, 1))
    x = crp(x, params['conv1_w'], params['conv1_b'])
    x = crp(x, params['conv2_w'], params['conv2_b'])
    x = jnp.transpose(x, (0, 3, 1, 2)).reshape(x.shape[0], -1)
    h = jnp.maximum(x @ params['fc1_w'].T + params['fc1_b'], 0.0)
    h = jnp.maximum(h @ params['fc2_w'].T + params['fc2_b'], 0.0)
    return h @ params['fc3_w'].T + params['fc3_b']


def init_params(key):
    ks = jax.random.split(key, 10)

    def u(k, shape, fan_in):
        bound = 1.0 / np.sqrt(fan_in)
        return jax.random.uniform(k, shape, jnp.float32, -bound, bound)

    return {
        'conv1_w': u(ks[0], (6, 1, 3, 3), 1 * 3 * 3),
        'conv1_b': u(ks[1], (6,), 1 * 3 * 3),
        'conv2_w': u(ks[2], (16, 6, 3, 3), 6 * 3 * 3),
        'conv2_b': u(ks[3], (16,), 6 * 3 * 3),
        'fc1_w': u(ks[4], (120, 16 * 6 * 6), 16 * 6 * 6),
        'fc1_b': u(ks[5], (120,), 16 * 6 * 6),
        'fc2_w': u(ks[6], (84, 120), 120),
        'fc2_b': u(ks[7], (84,), 120),
        'fc3_w': u(ks[8], (10, 84), 84),
        'fc3_b': u(ks[9], (10,), 84),
    }


if __name__ == "__main__":
    key = jax.random.PRNGKey(0)
    kp, kx = jax.random.split(key)
    params = init_params(kp)
    packed = pack_params(params)          # one-time weight packing (host side)
    # fc1 expects 16*6*6 features -> the forward implies a (N, 1, 32, 32) input
    x = jax.random.normal(kx, (2, 1, 32, 32), jnp.float32)

    fwd = jax.jit(net_forward)
    out = jax.block_until_ready(fwd(packed, x))

    with jax.default_matmul_precision('highest'):
        ref = net_reference(params, x)
    assert out.shape == (2, 10), out.shape
    np.testing.assert_allclose(np.asarray(out), np.asarray(ref),
                               rtol=2e-3, atol=2e-3)
    print("KERNEL_OK")
</pallas_src>

<mosaic_0001>
module attributes {stable_mosaic.version = 11 : i64} {
  func.func @_net_kernel(%arg0: i32, %arg1: memref<1x32x32xf32, #tpu.memory_space<vmem>>, %arg2: memref<96x256xf32, #tpu.memory_space<vmem>>, %arg3: memref<1x90xf32, #tpu.memory_space<vmem>>, %arg4: memref<270x256xf32, #tpu.memory_space<vmem>>, %arg5: memref<1x576xf32, #tpu.memory_space<vmem>>, %arg6: memref<576x128xf32, #tpu.memory_space<vmem>>, %arg7: memref<1x128xf32, #tpu.memory_space<vmem>>, %arg8: memref<128x128xf32, #tpu.memory_space<vmem>>, %arg9: memref<1x128xf32, #tpu.memory_space<vmem>>, %arg10: memref<128x128xf32, #tpu.memory_space<vmem>>, %arg11: memref<1x128xf32, #tpu.memory_space<vmem>>, %arg12: memref<1x1x128xf32, #tpu.memory_space<vmem>>) attributes {dimension_semantics = [#tpu.dimension_semantics<parallel>], iteration_bounds = array<i64: 2>, scalar_prefetch = 0 : i64, scratch_operands = 0 : i64, tpu.core_type = #tpu.core_type<tc>, window_params = [{transform_indices = @transform_0, window_bounds = array<i64: 1, 32, 32>}, {pipeline_mode = #tpu.pipeline_mode<synchronous>, transform_indices = @transform_1, window_bounds = array<i64: 96, 256>}, {pipeline_mode = #tpu.pipeline_mode<synchronous>, transform_indices = @transform_2, window_bounds = array<i64: 1, 90>}, {pipeline_mode = #tpu.pipeline_mode<synchronous>, transform_indices = @transform_3, window_bounds = array<i64: 270, 256>}, {pipeline_mode = #tpu.pipeline_mode<synchronous>, transform_indices = @transform_4, window_bounds = array<i64: 1, 576>}, {pipeline_mode = #tpu.pipeline_mode<synchronous>, transform_indices = @transform_5, window_bounds = array<i64: 576, 128>}, {pipeline_mode = #tpu.pipeline_mode<synchronous>, transform_indices = @transform_6, window_bounds = array<i64: 1, 128>}, {pipeline_mode = #tpu.pipeline_mode<synchronous>, transform_indices = @transform_7, window_bounds = array<i64: 128, 128>}, {pipeline_mode = #tpu.pipeline_mode<synchronous>, transform_indices = @transform_8, window_bounds = array<i64: 1, 128>}, {pipeline_mode = #tpu.pipeline_mode<synchronous>, transform_indices = @transform_9, window_bounds = array<i64: 128, 128>}, {pipeline_mode = #tpu.pipeline_mode<synchronous>, transform_indices = @transform_10, window_bounds = array<i64: 1, 128>}, {transform_indices = @transform_11, window_bounds = array<i64: 1, 1, 128>}]} {
    %c0 = arith.constant 0 : index
    %c0_0 = arith.constant 0 : index
    %c0_1 = arith.constant 0 : index
    %0 = vector.load %arg1[%c0, %c0_0, %c0_1] : memref<1x32x32xf32, #tpu.memory_space<vmem>>, vector<1x32x32xf32>
    %1 = vector.shape_cast %0 : vector<1x32x32xf32> to vector<32x32xf32>
    %2 = vector.extract_strided_slice %1 {offsets = [0, 0], sizes = [30, 32], strides = [1, 1]} : vector<32x32xf32> to vector<30x32xf32>
    %3 = vector.extract_strided_slice %1 {offsets = [1, 0], sizes = [30, 32], strides = [1, 1]} : vector<32x32xf32> to vector<30x32xf32>
    %4 = vector.extract_strided_slice %1 {offsets = [2, 0], sizes = [30, 32], strides = [1, 1]} : vector<32x32xf32> to vector<30x32xf32>
    %5 = tpu.concatenate %2, %3, %4 in 1 : vector<30x32xf32>, vector<30x32xf32>, vector<30x32xf32> -> vector<30x96xf32>
    %c0_2 = arith.constant 0 : index
    %c0_3 = arith.constant 0 : index
    %6 = vector.load %arg2[%c0_2, %c0_3] : memref<96x256xf32, #tpu.memory_space<vmem>>, vector<96x256xf32>
    %cst = arith.constant dense<0.000000e+00> : vector<30x256xf32>
    %7 = tpu.matmul %5, %6, %cst {dimension_numbers = #tpu.dot_dimension_numbers<[1], [0], [0], [1], [0, 0, 1, 1], [], []>} : vector<30x96xf32>, vector<96x256xf32>, vector<30x256xf32> -> vector<30x256xf32>
    %8 = vector.extract_strided_slice %7 {offsets = [0, 0], sizes = [30, 90], strides = [1, 1]} : vector<30x256xf32> to vector<30x90xf32>
    %9 = vector.extract_strided_slice %7 {offsets = [0, 128], sizes = [30, 90], strides = [1, 1]} : vector<30x256xf32> to vector<30x90xf32>
    %10 = arith.maximumf %8, %9 : vector<30x90xf32>
    %11 = vector.extract_strided_slice %10 {offsets = [0, 0], sizes = [1, 90], strides = [1, 1]} : vector<30x90xf32> to vector<1x90xf32>
    %12 = vector.extract_strided_slice %10 {offsets = [1, 0], sizes = [1, 90], strides = [1, 1]} : vector<30x90xf32> to vector<1x90xf32>
    %13 = arith.maximumf %11, %12 : vector<1x90xf32>
    %14 = vector.extract_strided_slice %10 {offsets = [2, 0], sizes = [1, 90], strides = [1, 1]} : vector<30x90xf32> to vector<1x90xf32>
    %15 = vector.extract_strided_slice %10 {offsets = [3, 0], sizes = [1, 90], strides = [1, 1]} : vector<30x90xf32> to vector<1x90xf32>
    %16 = arith.maximumf %14, %15 : vector<1x90xf32>
    %17 = vector.extract_strided_slice %10 {offsets = [4, 0], sizes = [1, 90], strides = [1, 1]} : vector<30x90xf32> to vector<1x90xf32>
    %18 = vector.extract_strided_slice %10 {offsets = [5, 0], sizes = [1, 90], strides = [1, 1]} : vector<30x90xf32> to vector<1x90xf32>
    %19 = arith.maximumf %17, %18 : vector<1x90xf32>
    %20 = vector.extract_strided_slice %10 {offsets = [6, 0], sizes = [1, 90], strides = [1, 1]} : vector<30x90xf32> to vector<1x90xf32>
    %21 = vector.extract_strided_slice %10 {offsets = [7, 0], sizes = [1, 90], strides = [1, 1]} : vector<30x90xf32> to vector<1x90xf32>
    %22 = arith.maximumf %20, %21 : vector<1x90xf32>
    %23 = vector.extract_strided_slice %10 {offsets = [8, 0], sizes = [1, 90], strides = [1, 1]} : vector<30x90xf32> to vector<1x90xf32>
    %24 = vector.extract_strided_slice %10 {offsets = [9, 0], sizes = [1, 90], strides = [1, 1]} : vector<30x90xf32> to vector<1x90xf32>
    %25 = arith.maximumf %23, %24 : vector<1x90xf32>
    %26 = vector.extract_strided_slice %10 {offsets = [10, 0], sizes = [1, 90], strides = [1, 1]} : vector<30x90xf32> to vector<1x90xf32>
    %27 = vector.extract_strided_slice %10 {offsets = [11, 0], sizes = [1, 90], strides = [1, 1]} : vector<30x90xf32> to vector<1x90xf32>
    %28 = arith.maximumf %26, %27 : vector<1x90xf32>
    %29 = vector.extract_strided_slice %10 {offsets = [12, 0], sizes = [1, 90], strides = [1, 1]} : vector<30x90xf32> to vector<1x90xf32>
    %30 = vector.extract_strided_slice %10 {offsets = [13, 0], sizes = [1, 90], strides = [1, 1]} : vector<30x90xf32> to vector<1x90xf32>
    %31 = arith.maximumf %29, %30 : vector<1x90xf32>
    %32 = vector.extract_strided_slice %10 {offsets = [14, 0], sizes = [1, 90], strides = [1, 1]} : vector<30x90xf32> to vector<1x90xf32>
    %33 = vector.extract_strided_slice %10 {offsets = [15, 0], sizes = [1, 90], strides = [1, 1]} : vector<30x90xf32> to vector<1x90xf32>
    %34 = arith.maximumf %32, %33 : vector<1x90xf32>
    %35 = vector.extract_strided_slice %10 {offsets = [16, 0], sizes = [1, 90], strides = [1, 1]} : vector<30x90xf32> to vector<1x90xf32>
    %36 = vector.extract_strided_slice %10 {offsets = [17, 0], sizes = [1, 90], strides = [1, 1]} : vector<30x90xf32> to vector<1x90xf32>
    %37 = arith.maximumf %35, %36 : vector<1x90xf32>
    %38 = vector.extract_strided_slice %10 {offsets = [18, 0], sizes = [1, 90], strides = [1, 1]} : vector<30x90xf32> to vector<1x90xf32>
    %39 = vector.extract_strided_slice %10 {offsets = [19, 0], sizes = [1, 90], strides = [1, 1]} : vector<30x90xf32> to vector<1x90xf32>
    %40 = arith.maximumf %38, %39 : vector<1x90xf32>
    %41 = vector.extract_strided_slice %10 {offsets = [20, 0], sizes = [1, 90], strides = [1, 1]} : vector<30x90xf32> to vector<1x90xf32>
    %42 = vector.extract_strided_slice %10 {offsets = [21, 0], sizes = [1, 90], strides = [1, 1]} : vector<30x90xf32> to vector<1x90xf32>
    %43 = arith.maximumf %41, %42 : vector<1x90xf32>
    %44 = vector.extract_strided_slice %10 {offsets = [22, 0], sizes = [1, 90], strides = [1, 1]} : vector<30x90xf32> to vector<1x90xf32>
    %45 = vector.extract_strided_slice %10 {offsets = [23, 0], sizes = [1, 90], strides = [1, 1]} : vector<30x90xf32> to vector<1x90xf32>
    %46 = arith.maximumf %44, %45 : vector<1x90xf32>
    %47 = vector.extract_strided_slice %10 {offsets = [24, 0], sizes = [1, 90], strides = [1, 1]} : vector<30x90xf32> to vector<1x90xf32>
    %48 = vector.extract_strided_slice %10 {offsets = [25, 0], sizes = [1, 90], strides = [1, 1]} : vector<30x90xf32> to vector<1x90xf32>
    %49 = arith.maximumf %47, %48 : vector<1x90xf32>
    %50 = vector.extract_strided_slice %10 {offsets = [26, 0], sizes = [1, 90], strides = [1, 1]} : vector<30x90xf32> to vector<1x90xf32>
    %51 = vector.extract_strided_slice %10 {offsets = [27, 0], sizes = [1, 90], strides = [1, 1]} : vector<30x90xf32> to vector<1x90xf32>
    %52 = arith.maximumf %50, %51 : vector<1x90xf32>
    %53 = vector.extract_strided_slice %10 {offsets = [28, 0], sizes = [1, 90], strides = [1, 1]} : vector<30x90xf32> to vector<1x90xf32>
    %54 = vector.extract_strided_slice %10 {offsets = [29, 0], sizes = [1, 90], strides = [1, 1]} : vector<30x90xf32> to vector<1x90xf32>
    %55 = arith.maximumf %53, %54 : vector<1x90xf32>
    %56 = tpu.concatenate %13, %16, %19, %22, %25, %28, %31, %34, %37, %40, %43, %46, %49, %52, %55 in 0 : vector<1x90xf32>, vector<1x90xf32>, vector<1x90xf32>, vector<1x90xf32>, vector<1x90xf32>, vector<1x90xf32>, vector<1x90xf32>, vector<1x90xf32>, vector<1x90xf32>, vector<1x90xf32>, vector<1x90xf32>, vector<1x90xf32>, vector<1x90xf32>, vector<1x90xf32>, vector<1x90xf32> -> vector<15x90xf32>
    %c0_4 = arith.constant 0 : index
    %c0_5 = arith.constant 0 : index
    %57 = vector.load %arg3[%c0_4, %c0_5] : memref<1x90xf32, #tpu.memory_space<vmem>>, vector<1x90xf32>
    %58 = vector.broadcast %57 : vector<1x90xf32> to vector<15x90xf32>
    %59 = arith.addf %56, %58 : vector<15x90xf32>
    %cst_6 = arith.constant 0.000000e+00 : f32
    %60 = vector.broadcast %cst_6 : f32 to vector<15x90xf32>
    %61 = arith.maximumf %59, %60 : vector<15x90xf32>
    %62 = vector.extract_strided_slice %61 {offsets = [0, 0], sizes = [12, 90], strides = [1, 1]} : vector<15x90xf32> to vector<12x90xf32>
    %63 = vector.extract_strided_slice %61 {offsets = [1, 0], sizes = [12, 90], strides = [1, 1]} : vector<15x90xf32> to vector<12x90xf32>
    %64 = vector.extract_strided_slice %61 {offsets = [2, 0], sizes = [12, 90], strides = [1, 1]} : vector<15x90xf32> to vector<12x90xf32>
    %65 = tpu.concatenate %62, %63, %64 in 1 : vector<12x90xf32>, vector<12x90xf32>, vector<12x90xf32> -> vector<12x270xf32>
    %c0_7 = arith.constant 0 : index
    %c0_8 = arith.constant 0 : index
    %66 = vector.load %arg4[%c0_7, %c0_8] : memref<270x256xf32, #tpu.memory_space<vmem>>, vector<270x256xf32>
    %cst_9 = arith.constant dense<0.000000e+00> : vector<12x256xf32>
    %67 = tpu.matmul %65, %66, %cst_9 {dimension_numbers = #tpu.dot_dimension_numbers<[1], [0], [0], [1], [0, 0, 1, 1], [], []>} : vector<12x270xf32>, vector<270x256xf32>, vector<12x256xf32> -> vector<12x256xf32>
    %68 = vector.extract_strided_slice %67 {offsets = [0, 0], sizes = [12, 96], strides = [1, 1]} : vector<12x256xf32> to vector<12x96xf32>
    %69 = vector.extract_strided_slice %67 {offsets = [0, 128], sizes = [12, 96], strides = [1, 1]} : vector<12x256xf32> to vector<12x96xf32>
    %70 = arith.maximumf %68, %69 : vector<12x96xf32>
    %71 = vector.extract_strided_slice %70 {offsets = [0, 0], sizes = [1, 96], strides = [1, 1]} : vector<12x96xf32> to vector<1x96xf32>
    %72 = vector.extract_strided_slice %70 {offsets = [1, 0], sizes = [1, 96], strides = [1, 1]} : vector<12x96xf32> to vector<1x96xf32>
    %73 = arith.maximumf %71, %72 : vector<1x96xf32>
    %74 = vector.extract_strided_slice %70 {offsets = [2, 0], sizes = [1, 96], strides = [1, 1]} : vector<12x96xf32> to vector<1x96xf32>
    %75 = vector.extract_strided_slice %70 {offsets = [3, 0], sizes = [1, 96], strides = [1, 1]} : vector<12x96xf32> to vector<1x96xf32>
    %76 = arith.maximumf %74, %75 : vector<1x96xf32>
    %77 = vector.extract_strided_slice %70 {offsets = [4, 0], sizes = [1, 96], strides = [1, 1]} : vector<12x96xf32> to vector<1x96xf32>
    %78 = vector.extract_strided_slice %70 {offsets = [5, 0], sizes = [1, 96], strides = [1, 1]} : vector<12x96xf32> to vector<1x96xf32>
    %79 = arith.maximumf %77, %78 : vector<1x96xf32>
    %80 = vector.extract_strided_slice %70 {offsets = [6, 0], sizes = [1, 96], strides = [1, 1]} : vector<12x96xf32> to vector<1x96xf32>
    %81 = vector.extract_strided_slice %70 {offsets = [7, 0], sizes = [1, 96], strides = [1, 1]} : vector<12x96xf32> to vector<1x96xf32>
    %82 = arith.maximumf %80, %81 : vector<1x96xf32>
    %83 = vector.extract_strided_slice %70 {offsets = [8, 0], sizes = [1, 96], strides = [1, 1]} : vector<12x96xf32> to vector<1x96xf32>
    %84 = vector.extract_strided_slice %70 {offsets = [9, 0], sizes = [1, 96], strides = [1, 1]} : vector<12x96xf32> to vector<1x96xf32>
    %85 = arith.maximumf %83, %84 : vector<1x96xf32>
    %86 = vector.extract_strided_slice %70 {offsets = [10, 0], sizes = [1, 96], strides = [1, 1]} : vector<12x96xf32> to vector<1x96xf32>
    %87 = vector.extract_strided_slice %70 {offsets = [11, 0], sizes = [1, 96], strides = [1, 1]} : vector<12x96xf32> to vector<1x96xf32>
    %88 = arith.maximumf %86, %87 : vector<1x96xf32>
    %89 = tpu.concatenate %73, %76, %79, %82, %85, %88 in 1 : vector<1x96xf32>, vector<1x96xf32>, vector<1x96xf32>, vector<1x96xf32>, vector<1x96xf32>, vector<1x96xf32> -> vector<1x576xf32>
    %c0_10 = arith.constant 0 : index
    %c0_11 = arith.constant 0 : index
    %90 = vector.load %arg5[%c0_10, %c0_11] : memref<1x576xf32, #tpu.memory_space<vmem>>, vector<1x576xf32>
    %91 = arith.addf %89, %90 : vector<1x576xf32>
    %cst_12 = arith.constant 0.000000e+00 : f32
    %92 = vector.broadcast %cst_12 : f32 to vector<1x576xf32>
    %93 = arith.maximumf %91, %92 : vector<1x576xf32>
    %c0_13 = arith.constant 0 : index
    %c0_14 = arith.constant 0 : index
    %94 = vector.load %arg6[%c0_13, %c0_14] : memref<576x128xf32, #tpu.memory_space<vmem>>, vector<576x128xf32>
    %cst_15 = arith.constant dense<0.000000e+00> : vector<1x128xf32>
    %95 = tpu.matmul %93, %94, %cst_15 {dimension_numbers = #tpu.dot_dimension_numbers<[1], [0], [0], [1], [0, 0, 1, 1], [], []>} : vector<1x576xf32>, vector<576x128xf32>, vector<1x128xf32> -> vector<1x128xf32>
    %c0_16 = arith.constant 0 : index
    %c0_17 = arith.constant 0 : index
    %96 = vector.load %arg7[%c0_16, %c0_17] : memref<1x128xf32, #tpu.memory_space<vmem>>, vector<1x128xf32>
    %97 = arith.addf %95, %96 : vector<1x128xf32>
    %cst_18 = arith.constant 0.000000e+00 : f32
    %98 = vector.broadcast %cst_18 : f32 to vector<1x128xf32>
    %99 = arith.maximumf %97, %98 : vector<1x128xf32>
    %c0_19 = arith.constant 0 : index
    %c0_20 = arith.constant 0 : index
    %100 = vector.load %arg8[%c0_19, %c0_20] : memref<128x128xf32, #tpu.memory_space<vmem>>, vector<128x128xf32>
    %cst_21 = arith.constant dense<0.000000e+00> : vector<1x128xf32>
    %101 = tpu.matmul %99, %100, %cst_21 {dimension_numbers = #tpu.dot_dimension_numbers<[1], [0], [0], [1], [0, 0, 1, 1], [], []>} : vector<1x128xf32>, vector<128x128xf32>, vector<1x128xf32> -> vector<1x128xf32>
    %c0_22 = arith.constant 0 : index
    %c0_23 = arith.constant 0 : index
    %102 = vector.load %arg9[%c0_22, %c0_23] : memref<1x128xf32, #tpu.memory_space<vmem>>, vector<1x128xf32>
    %103 = arith.addf %101, %102 : vector<1x128xf32>
    %cst_24 = arith.constant 0.000000e+00 : f32
    %104 = vector.broadcast %cst_24 : f32 to vector<1x128xf32>
    %105 = arith.maximumf %103, %104 : vector<1x128xf32>
    %c0_25 = arith.constant 0 : index
    %c0_26 = arith.constant 0 : index
    %106 = vector.load %arg10[%c0_25, %c0_26] : memref<128x128xf32, #tpu.memory_space<vmem>>, vector<128x128xf32>
    %cst_27 = arith.constant dense<0.000000e+00> : vector<1x128xf32>
    %107 = tpu.matmul %105, %106, %cst_27 {dimension_numbers = #tpu.dot_dimension_numbers<[1], [0], [0], [1], [0, 0, 1, 1], [], []>} : vector<1x128xf32>, vector<128x128xf32>, vector<1x128xf32> -> vector<1x128xf32>
    %c0_28 = arith.constant 0 : index
    %c0_29 = arith.constant 0 : index
    %108 = vector.load %arg11[%c0_28, %c0_29] : memref<1x128xf32, #tpu.memory_space<vmem>>, vector<1x128xf32>
    %109 = arith.addf %107, %108 : vector<1x128xf32>
    %c0_30 = arith.constant 0 : index
    %c0_31 = arith.constant 0 : index
    %c0_32 = arith.constant 0 : index
    %110 = vector.load %arg12[%c0_30, %c0_31, %c0_32] : memref<1x1x128xf32, #tpu.memory_space<vmem>>, vector<1x1x128xf32>
    %111 = vector.shape_cast %110 : vector<1x1x128xf32> to vector<1x128xf32>
    %112 = vector.shape_cast %109 : vector<1x128xf32> to vector<1x1x128xf32>
    tpu.vector_store %arg12[%c0_30, %c0_31, %c0_32], %112 {strides = array<i32>} : memref<1x1x128xf32, #tpu.memory_space<vmem>>, vector<1x1x128xf32>,
    return
  }
  func.func @transform_0(%arg0: i32) -> (i32, i32, i32) {
    %c0_i32 = arith.constant 0 : i32
    %c0_i32_0 = arith.constant 0 : i32
    %c0_i32_1 = arith.constant 0 : i32
    return %arg0, %c0_i32, %c0_i32_0 : i32, i32, i32
  }
  func.func @transform_1(%arg0: i32) -> (i32, i32) {
    %c0_i32 = arith.constant 0 : i32
    %c0_i32_0 = arith.constant 0 : i32
    %c0_i32_1 = arith.constant 0 : i32
    return %c0_i32, %c0_i32_0 : i32, i32
  }
  func.func @transform_2(%arg0: i32) -> (i32, i32) {
    %c0_i32 = arith.constant 0 : i32
    %c0_i32_0 = arith.constant 0 : i32
    %c0_i32_1 = arith.constant 0 : i32
    return %c0_i32, %c0_i32_0 : i32, i32
  }
  func.func @transform_3(%arg0: i32) -> (i32, i32) {
    %c0_i32 = arith.constant 0 : i32
    %c0_i32_0 = arith.constant 0 : i32
    %c0_i32_1 = arith.constant 0 : i32
    return %c0_i32, %c0_i32_0 : i32, i32
  }
  func.func @transform_4(%arg0: i32) -> (i32, i32) {
    %c0_i32 = arith.constant 0 : i32
    %c0_i32_0 = arith.constant 0 : i32
    %c0_i32_1 = arith.constant 0 : i32
    return %c0_i32, %c0_i32_0 : i32, i32
  }
  func.func @transform_5(%arg0: i32) -> (i32, i32) {
    %c0_i32 = arith.constant 0 : i32
    %c0_i32_0 = arith.constant 0 : i32
    %c0_i32_1 = arith.constant 0 : i32
    return %c0_i32, %c0_i32_0 : i32, i32
  }
  func.func @transform_6(%arg0: i32) -> (i32, i32) {
    %c0_i32 = arith.constant 0 : i32
    %c0_i32_0 = arith.constant 0 : i32
    %c0_i32_1 = arith.constant 0 : i32
    return %c0_i32, %c0_i32_0 : i32, i32
  }
  func.func @transform_7(%arg0: i32) -> (i32, i32) {
    %c0_i32 = arith.constant 0 : i32
    %c0_i32_0 = arith.constant 0 : i32
    %c0_i32_1 = arith.constant 0 : i32
    return %c0_i32, %c0_i32_0 : i32, i32
  }
  func.func @transform_8(%arg0: i32) -> (i32, i32) {
    %c0_i32 = arith.constant 0 : i32
    %c0_i32_0 = arith.constant 0 : i32
    %c0_i32_1 = arith.constant 0 : i32
    return %c0_i32, %c0_i32_0 : i32, i32
  }
  func.func @transform_9(%arg0: i32) -> (i32, i32) {
    %c0_i32 = arith.constant 0 : i32
    %c0_i32_0 = arith.constant 0 : i32
    %c0_i32_1 = arith.constant 0 : i32
    return %c0_i32, %c0_i32_0 : i32, i32
  }
  func.func @transform_10(%arg0: i32) -> (i32, i32) {
    %c0_i32 = arith.constant 0 : i32
    %c0_i32_0 = arith.constant 0 : i32
    %c0_i32_1 = arith.constant 0 : i32
    return %c0_i32, %c0_i32_0 : i32, i32
  }
  func.func @transform_11(%arg0: i32) -> (i32, i32, i32) {
    %c0_i32 = arith.constant 0 : i32
    %c0_i32_0 = arith.constant 0 : i32
    %c0_i32_1 = arith.constant 0 : i32
    return %arg0, %c0_i32, %c0_i32_0 : i32, i32, i32
  }
}

</mosaic_0001>

<bundles_post_ra>
// kernel: net_forward.1
= control target key start
LH: loop header
LB: loop body
LE: loop exit
PB: predicated region body
PF: predicated region fallthrough
CT: control target
= control target key end

     0   :  { %s3010_s0 = inlined_call_operand.hbm [shape: f32[2,32,32], index: 0, kind: input, shape index: {}]   ;;  %s3011_s1 = inlined_call_operand.hbm [shape: f32[96,256], index: 1, kind: input, shape index: {}]   ;;  %s3012_s2 = inlined_call_operand.vmem [shape: f32[1,90], index: 2, kind: input, shape index: {}]   ;;  %s3013_s3 = inlined_call_operand.hbm [shape: f32[270,256], index: 3, kind: input, shape index: {}]   ;;  %s3014_s4 = inlined_call_operand.vmem [shape: f32[1,576], index: 4, kind: input, shape index: {}]   ;;  %s3015_s5 = inlined_call_operand.hbm [shape: f32[576,128], index: 5, kind: input, shape index: {}]   ;;  %s3016_s6 = inlined_call_operand.vmem [shape: f32[1,128], index: 6, kind: input, shape index: {}]   ;;  %s3017_s7 = inlined_call_operand.hbm [shape: f32[128,128], index: 7, kind: input, shape index: {}]   ;;  %s3018_s8 = inlined_call_operand.vmem [shape: f32[1,128], index: 8, kind: input, shape index: {}]   ;;  %s3019_s9 = inlined_call_operand.hbm [shape: f32[128,128], index: 9, kind: input, shape index: {}]   ;;  %s3020_s10 = inlined_call_operand.vmem [shape: f32[1,128], index: 10, kind: input, shape index: {}]   ;;  %s3021_s11 = inlined_call_operand.hbm [shape: f32[2,1,128], index: 11, kind: output, shape index: {}]  }
   0x1   :  { %3031 = sst [smem:[#allocation19_spill]] %s3011_s1 }
   0x2   :  { %3032 = sst [smem:[#allocation20_spill]] %s3013_s3 }
   0x3   :  { %3033 = sst [smem:[#allocation21_spill]] %s3018_s8 }
   0x4   :  { %3034 = sst [smem:[#allocation22_spill]] %s3020_s10 }
   0x5   :  { %3035 = sst [smem:[#allocation23_spill]] %s3021_s11 }
   0x6   :  { %16 = vsyncpa [#allocation3], 0 }
   0x7   :  { %18 = vsyncpa [#allocation3 + $0x1], 0 }
   0x8   :  { %19 = vsyncpa [#allocation6], 0 }
   0x9   :  { %20 = vsyncpa [#allocation9], 0 }
   0xa   :  { %21 = vsyncpa [#allocation12], 0 }
   0xb   :  { %22 = vsyncpa [#allocation4], 0 }
   0xc   :  { %24 = vsyncpa [#allocation4 + $0x1], 0  ;;  %s2554_s17 = smov 0   ;;  %s2556_s18 = smov 0  }
   0xd   :  { %s2558_s19 = smov 0   ;;  %s2560_s20 = smov 0  }
   0xe LB: > { %s2474_s21 = smov [#allocation5]   ;;  %s2575_s23 = sadd.s32 4294967295, %s2472_s20   ;;  %s2472_s20 = sphi %s2560_s20, %s3067_s20   ;;  %s2468_s19 = sphi %s2558_s19, %s3066_s19   ;;  %s2464_s18 = sphi %s2556_s18, %s3065_s18   ;;  %s2460_s17 = sphi %s2554_s17, %s3064_s17  }
   0xf   : > { %s309_s22 = sshll.u32 %s2474_s21, 4  ;;  %p1659_p0 = scmp.ge.s32.totalorder %s2472_s20, 1  ;;  %s2580_s22 = int_to_ptr.vmem [resolvable:$true] %s309_s22 }
  0x10   : > { %p3024_p1 = scmp.eq.s32.totalorder %s2575_s23, 0  ;;  %p297_p2 = scmp.lt.s32.totalorder %s2472_s20, 3 }
  0x11   : > { %s2475_s25 = smov [#allocation8]   ;;  %s2476_s28 = smov [#allocation7]  }
  0x12   : > { %p2582_p3 = pnand %p1659_p0, %p297_p2  ;;  %s341_s26 = sshll.u32 %s2475_s25, 4  ;;  %s2595_s26 = int_to_ptr.vmem [resolvable:$true] %s341_s26 }
  0x13   : > { %s2597_s29 = sshll.u32 %s2476_s28, 4  ;;  %s3038_s1 = sld [smem:[#allocation19_spill]]  ;;  %s326_s29 = int_to_ptr.vmem [resolvable:$true] %s2597_s29 }
  0x14   : > { %s3036_s24 = scalar_select %p2582_p3, 1, 0 }
  0x15   : > { %p2138_p5 = pneg %p2582_p3 }
  0x17   : > { %p2591_p6 = pnand %p2138_p5, %p3024_p1 }
  0x19   : > { %s2224_s13 = scalar_lea.hbm %s3038_s1, 3072  ;;  %p2607_p8 = pneg %p2591_p6 }
  0x1a   : > { %p2225_p7 = scmp.ne.s32.totalorder %s3038_s1, %s2224_s13  ;;  %p2231_p11 = scmp.lt.u32.totalorder %s2224_s13, %s3038_s1 }
  0x1c   : > { %p2227_p9 = pnand %p2607_p8, %p2225_p7 }
  0x1e   : > { %p2228_p10 = pneg %p2227_p9 }
  0x20   : > { %p2233_p12 = pnand %p2231_p11, %p2228_p10 }
  0x22   : > { %2236 = shalt.err (!%p2233_p12)
}
  0x23   : > { %s2237_s28 = scalar_lea.vmem %s2580_s22, 3072  ;;  %p2245_p5 = scmp.lt.s32.totalorder %s2580_s22, %s2580_s22 }
  0x24   : > { %p2238_p13 = scmp.ne.s32.totalorder %s2580_s22, %s2237_s28  ;;  %p2246_p4 = scmp.lt.s32.totalorder %s2237_s28, %s2237_s28 }
  0x26   : > { %p2240_p0 = pnand %p2238_p13, %p2607_p8  ;;  %p2247_p7 = por %p2246_p4, %p2245_p5 }
  0x28   : > { %p2241_p2 = pneg %p2240_p0 }
  0x2a   : > { %p2248_p9 = pnand %p2247_p7, %p2241_p2 }
  0x2c   : > { %2251 = shalt.err (!%p2248_p9)
}
  0x2d   : > { %s3023_s30 = smov 256   ;;  %s2478_s12 = smov 16  }
  0x2e   : > { %2141 = dma.hbm_to_vmem [thread:$0]  (!%p2591_p6), %s3038_s1, 3072, %s2580_s22, [#allocation6], %s3023_s30, %s3023_s30, %s2478_s12  }
  0x2f   : > { %s2252_s25 = scalar_lea.hbm %s3015_s5, 9216 }
  0x30   : > { %p2253_p4 = scmp.ne.s32.totalorder %s3015_s5, %s2252_s25  ;;  %p2259_p12 = scmp.lt.u32.totalorder %s2252_s25, %s3015_s5 }
  0x32   : > { %p2255_p10 = pnand %p2253_p4, %p2607_p8 }
  0x34   : > { %p2256_p11 = pneg %p2255_p10 }
  0x36   : > { %p2261_p13 = pnand %p2259_p12, %p2256_p11 }
  0x38   : > { %2264 = shalt.err (!%p2261_p13)
}
  0x39   : > { %s2265_s22 = scalar_lea.vmem %s2595_s26, 9216  ;;  %p2273_p7 = scmp.lt.s32.totalorder %s2595_s26, %s2595_s26 }
  0x3a   : > { %p2266_p0 = scmp.ne.s32.totalorder %s2595_s26, %s2265_s22  ;;  %p2274_p9 = scmp.lt.s32.totalorder %s2265_s22, %s2265_s22 }
  0x3c   : > { %p2268_p2 = pnand %p2266_p0, %p2607_p8  ;;  %p2275_p4 = por %p2274_p9, %p2273_p7 }
  0x3e   : > { %p2269_p5 = pneg %p2268_p2 }
  0x40   : > { %p2276_p10 = pnand %p2275_p4, %p2269_p5 }
  0x42   : > { %2279 = shalt.err (!%p2276_p10)
}
  0x43   : > { %s3026_s11 = smov 128   ;;  %s3028_s8 = smov 8  }
  0x44   : > { %2147 = dma.hbm_to_vmem [thread:$0]  (!%p2591_p6), %s3015_s5, 9216, %s2595_s26, [#allocation9], %s3026_s11, %s3026_s11, %s3028_s8  }
  0x45   : > { %s3040_s3 = sld [smem:[#allocation20_spill]] }
  0x4b   : > { %s2280_s21 = scalar_lea.hbm %s3040_s3, 8704 }
  0x4c   : > { %p2281_p11 = scmp.ne.s32.totalorder %s3040_s3, %s2280_s21  ;;  %p2287_p0 = scmp.lt.u32.totalorder %s2280_s21, %s3040_s3 }
  0x4e   : > { %p2283_p12 = pnand %p2281_p11, %p2607_p8 }
  0x50   : > { %p2284_p13 = pneg %p2283_p12 }
  0x52   : > { %p2289_p2 = pnand %p2287_p0, %p2284_p13 }
  0x54   : > { %2292 = shalt.err (!%p2289_p2)
}
  0x55   : > { %s2293_s10 = scalar_lea.vmem %s326_s29, 8704  ;;  %p2301_p4 = scmp.lt.s32.totalorder %s326_s29, %s326_s29 }
  0x56   : > { %p2294_p5 = scmp.ne.s32.totalorder %s326_s29, %s2293_s10  ;;  %p2302_p10 = scmp.lt.s32.totalorder %s2293_s10, %s2293_s10 }
  0x58   : > { %p2296_p7 = pnand %p2294_p5, %p2607_p8  ;;  %p2303_p1 = por %p2302_p10, %p2301_p4 }
  0x5a   : > { %p2297_p9 = pneg %p2296_p7 }
  0x5c   : > { %p2304_p3 = pnand %p2303_p1, %p2297_p9 }
  0x5e   : > { %2307 = shalt.err (!%p2304_p3)
}
  0x5f   : > { %s3041_s26 = smov 256   ;;  %s2481_s14 = smov [#allocation10]  }
  0x60   : > { %2144 = dma.hbm_to_vmem [thread:$0]  (!%p2591_p6), %s3040_s3, 8704, %s326_s29, [#allocation6], %s3041_s26, %s3041_s26, %s2478_s12  }
  0x61   : > { %s357_s15 = sshll.u32 %s2481_s14, 4  ;;  %s2482_s21 = smov [#allocation11]   ;;  %s358_s15 = int_to_ptr.vmem [resolvable:$true] %s357_s15 }
  0x62   : > { %s373_s25 = sshll.u32 %s2482_s21, 4  ;;  %s2308_s10 = scalar_lea.hbm %s3017_s7, 2048  ;;  %s374_s25 = int_to_ptr.vmem [resolvable:$true] %s373_s25 }
  0x63   : > { %p2309_p1 = scmp.ne.s32.totalorder %s3017_s7, %s2308_s10  ;;  %p2315_p12 = scmp.lt.u32.totalorder %s2308_s10, %s3017_s7 }
  0x65   : > { %p2311_p3 = pnand %p2309_p1, %p2607_p8 }
  0x67   : > { %p2312_p11 = pneg %p2311_p3 }
  0x69   : > { %p2317_p13 = pnand %p2315_p12, %p2312_p11 }
  0x6b   : > { %2320 = shalt.err (!%p2317_p13)
}
  0x6c   : > { %s2321_s29 = scalar_lea.vmem %s358_s15, 2048  ;;  %p2329_p7 = scmp.lt.s32.totalorder %s358_s15, %s358_s15 }
  0x6d   : > { %p2322_p0 = scmp.ne.s32.totalorder %s358_s15, %s2321_s29  ;;  %p2330_p9 = scmp.lt.s32.totalorder %s2321_s29, %s2321_s29 }
  0x6f   : > { %p2324_p2 = pnand %p2322_p0, %p2607_p8  ;;  %p2331_p4 = por %p2330_p9, %p2329_p7 }
  0x71   : > { %p2325_p5 = pneg %p2324_p2 }
  0x73   : > { %p2332_p10 = pnand %p2331_p4, %p2325_p5 }
  0x75   : > { %2335 = shalt.err (!%p2332_p10)
}
  0x76   : > { %s3042_s12 = smov 8   ;;  %s3043_s11 = smov 128  }
  0x77   : > { %2150 = dma.hbm_to_vmem [thread:$0]  (!%p2591_p6), %s3017_s7, 2048, %s358_s15, [#allocation9], %s3043_s11, %s3043_s11, %s3042_s12  }
  0x78   : > { %s2336_s14 = scalar_lea.hbm %s3019_s9, 2048 }
  0x79   : > { %p2337_p1 = scmp.ne.s32.totalorder %s3019_s9, %s2336_s14  ;;  %p2343_p12 = scmp.lt.u32.totalorder %s2336_s14, %s3019_s9 }
  0x7b   : > { %p2339_p3 = pnand %p2337_p1, %p2607_p8 }
  0x7d   : > { %p2340_p11 = pneg %p2339_p3 }
  0x7f   : > { %p2345_p13 = pnand %p2343_p12, %p2340_p11 }
  0x81   : > { %2348 = shalt.err (!%p2345_p13)
}
  0x82   : > { %s2349_s30 = scalar_lea.vmem %s374_s25, 2048  ;;  %p2357_p7 = scmp.lt.s32.totalorder %s374_s25, %s374_s25 }
  0x83   : > { %p2350_p0 = scmp.ne.s32.totalorder %s374_s25, %s2349_s30  ;;  %p2358_p9 = scmp.lt.s32.totalorder %s2349_s30, %s2349_s30 }
  0x85   : > { %p2352_p2 = pnand %p2350_p0, %p2607_p8  ;;  %p2359_p4 = por %p2358_p9, %p2357_p7 }
  0x87   : > { %p2353_p5 = pneg %p2352_p2 }
  0x89   : > { %p2360_p10 = pnand %p2359_p4, %p2353_p5 }
  0x8b   : > { %2363 = shalt.err (!%p2360_p10)
}
  0x8c   : > { %2153 = dma.hbm_to_vmem [thread:$0]  (!%p2591_p6), %s3019_s9, 2048, %s374_s25, [#allocation12], %s3043_s11, %s3043_s11, %s3042_s12  }
  0x8d   : > { %s1658_s27 = sadd.s32 4294967294, %s2472_s20   ;;  %s2723_s16 = sadd.s32 1, %s2472_s20  }
  0x8e   : > { %s37_s1 = sadd.s32 1, %s2468_s19  ;;  %s34_s8 = ssub.s32 %s2472_s20, %s2723_s16 }
  0x8f   : > { %p44_p8 = scmp.ne.s32.totalorder %s2468_s19, %s2464_s18  ;;  %p35_p1 = scmp.eq.s32.totalorder %s34_s8, 0 }
  0x90   : > { %p45_p3 = scmp.eq.s32.totalorder %s2472_s20, 0  ;;  %p50_p11 = scmp.ne.s32.totalorder %s2464_s18, %s2460_s17 }
  0x91   : > { %p284_p12 = scmp.eq.s32.totalorder %s2575_s23, 1  ;;  %p3044_p0 = scmp.eq.s32.totalorder %s2575_s23, 0 }
  0x92   : > { %s2735_s26 = scalar_select %p35_p1, %s2468_s19, %s37_s1  }
  0x93   : > { %p46_p13 = por %p45_p3, %p44_p8  ;;  %p2739_p2 = por %p3044_p0, %p50_p11 }
  0x94   : > { %p2743_p6 = por %p284_p12, %p44_p8  ;;  %p290_p5 = scmp.eq.s32.totalorder %s1658_s27, 1 }
  0x95   : > { %p2167_p7 = scmp.lt.s32.totalorder %s2472_s20, 2  ;;  %s390_s14 = sand.u32 1, %s2468_s19  }
  0x96   : > { %s3046_s25 = scalar_select %p2743_p6, 1, 0 }
  0x97   : > { %p2749_p9 = por %p290_p5, %p50_p11  ;;  %s1666_s28 = sshll.u32 %s390_s14, 5 }
  0x98   : > { %s1689_s22 = sshll.u32 %s2472_s20, 9  ;;  %s394_s29 = scalar_lea.vmem [#allocation2], %s1666_s28 }
  0x99   : > { %s3047_s21 = scalar_select %p2749_p9, 1, 0 }
  0x9a   : > { %s2757_s15 = scalar_lea.hbm %s3010_s0, %s1689_s22  ;;  %s401_s1 = sshll.u32 %s394_s29, 4  ;;  %s2763_s1 = int_to_ptr.vmem [resolvable:$true] %s401_s1 }
  0x9b   : > { %p2759_p4 = pnand %p2167_p7, %p46_p13  ;;  %s2765_s8 = scalar_lea.sflag [#allocation3], %s390_s14 }
  0x9c   : > { %s2364_s3 = scalar_lea.hbm %s2757_s15, 512  ;;  %s2369_s10 = scalar_lea.hbm %s3010_s0, 1024 }
  0x9d   : > { %p2365_p10 = scmp.ne.s32.totalorder %s2757_s15, %s2364_s3  ;;  %p2366_p8 = pneg %p2759_p4 }
  0x9e   : > { %p2370_p11 = scmp.lt.u32.totalorder %s2757_s15, %s3010_s0  ;;  %p2371_p12 = scmp.lt.u32.totalorder %s2369_s10, %s2364_s3 }
  0x9f   : > { %p2367_p1 = pnand %p2366_p8, %p2365_p10  ;;  %p2373_p0 = scmp.lt.u32.totalorder %s2364_s3, %s2757_s15 }
  0xa0   : > { %p2372_p13 = por %p2371_p12, %p2370_p11 }
  0xa1   : > { %p2368_p3 = pneg %p2367_p1 }
  0xa2   : > { %p2374_p5 = por %p2373_p0, %p2372_p13 }
  0xa4   : > { %p2375_p7 = pnand %p2374_p5, %p2368_p3 }
  0xa6   : > { %2378 = shalt.err (!%p2375_p7)
}
  0xa7   : > { %s2379_s14 = scalar_lea.vmem %s2763_s1, 512  ;;  %s2483_s28 = smov [#allocation2]  }
  0xa8   : > { %p2380_p10 = scmp.ne.s32.totalorder %s2763_s1, %s2379_s14  ;;  %s2384_s22 = sshll.u32 %s2483_s28, 4  ;;  %s2385_s22 = int_to_ptr.vmem [resolvable:$false] %s2384_s22 }
  0xa9   : > { %s2386_s30 = scalar_lea.vmem %s2385_s22, 1024  ;;  %p2387_p6 = scmp.lt.s32.totalorder %s2763_s1, %s2385_s22 }
  0xaa   : > { %p2382_p1 = pnand %p2380_p10, %p2366_p8  ;;  %p2388_p11 = scmp.lt.s32.totalorder %s2386_s30, %s2379_s14 }
  0xac   : > { %p2383_p9 = pneg %p2382_p1  ;;  %p2389_p12 = por %p2388_p11, %p2387_p6 }
  0xae   : > { %p2390_p13 = pnand %p2389_p12, %p2383_p9 }
  0xb0   : > { %2393 = shalt.err (!%p2390_p13)
}
  0xb1   : > { %2157 = dma.hbm_to_vmem [thread:$0]  (!%p2759_p4), %s2757_s15, 512, %s2763_s1, %s2765_s8, %s3043_s11, %s3043_s11, %s3042_s12  }
  0xb2   : > { %p3049_p8 = scmp.ne.s32.totalorder %s3036_s24, 0 }
  0xb3   : > { %s2799_s3 = sand.u32 (!%p3049_p8), 1, %s2464_s18  }
  0xb4   : > { %413 = sbr.rel (%p3049_p8) target bundleno = 1729 (0x6c1), region = 64  ;;  %s1670_s10 = sshll.u32 (!%p3049_p8), %s2799_s3, 5 }
  0xb5   : > { %s416_s29 = scalar_lea.sflag (!%p3049_p8), [#allocation3], %s2799_s3  ;;  %s419_s14 = scalar_lea.vmem (!%p3049_p8), [#allocation2], %s1670_s10 }
  0xbb   : > { %2439 = dma.done.wait (%p2739_p2), %s416_s29, 512  }
  0xbc   : > { %2441 = vsyncadd (%p2739_p2), %s416_s29, 4294966784  ;;  %p3050_p6 = scmp.eq.s32.totalorder %s2575_s23, 0 }
  0xbe   : > { %2443 = dma.done.wait (%p3050_p6), [#allocation6], 11776   ;;  %p3051_p9 = pmov %p3050_p6 }
  0xbf   : > { %p3052_p4 = pmov %p3050_p6 }
  0xc0   : > { %2445 = vsyncadd (%p3051_p9), [#allocation6], 4294955520 }
  0xc1   : > { %2447 = dma.done.wait (%p3052_p4), [#allocation9], 11264   ;;  %p3053_p3 = pmov %p3052_p4 }
  0xc3   : > { %2449 = vsyncadd (%p3053_p3), [#allocation9], 4294956032  ;;  %p3054_p0 = pmov %p3053_p3 }
  0xc5   : > { %2451 = dma.done.wait (%p3054_p0), [#allocation12], 2048   ;;  %p3055_p5 = pmov %p3054_p0 }
  0xc6   : > { %v2484_v0 = vmov 0.0   ;;  %v2820_v1 = vld [vmem:[%s419_s14] sm:$0xff]  ;;  %v2822_v2 = vld [vmem:[%s419_s14 + $0x8] sm:$0xff]  ;;  %vm485_vm0 = vcmask 1046528   ;;  %v2824_v3 = vld [vmem:[%s419_s14 + $0x10] sm:$0xff]  ;;  %vm505_vm1 = vcmask 1045504  }
  0xc7   : > { %2453 = vsyncadd (%p3055_p5), [#allocation12], 4294965248  ;;  %636 = vmatprep.mubr.f32.mxu0 %v2484_v0  ;;  %v486_v4 = vrot.slane %v2820_v1, 1  ;;  %v487_v5 = vrot.slane %v2822_v2, 1  ;;  %v489_v6 = vrot.slane %v2824_v3, 1  ;;  %v506_v7 = vrot.slane %v2820_v1, 2 }
  0xc8   : > { %v2830_v8 = vld [vmem:[%s419_s14 + $0x18] sm:$0xff]  ;;  %v536_v9 = vld [vmem:[#allocation5 + $0x8] sm:$0xff]  ;;  %v507_v10 = vrot.slane %v2822_v2, 2  ;;  %v509_v11 = vrot.slane %v2824_v3, 2  ;;  %v535_v13 = vld [vmem:[#allocation5] sm:$0xff]  ;;  %s2485_s24 = smov 32  }
  0xc9   : > { %v538_v12 = vld [vmem:[#allocation5 + $0x18] sm:$0xff]  ;;  %v488_v14 = vsel %vm485_vm0, %v486_v4, %v487_v5  ;;  %v490_v15 = vsel %vm485_vm0, %v487_v5, %v489_v6  ;;  %v537_v17 = vld [vmem:[#allocation5 + $0x10] sm:$0xff]  ;;  %v540_v18 = vld [vmem:[#allocation5 + $0x28] sm:$0xff]  ;;  %v491_v20 = vrot.slane %v2830_v8, 1  ;;  %v511_v21 = vrot.slane %v2830_v8, 2  ;;  %s2486_s12 = smov 64  }
  0xca   : > { %v1892_v16 = vpack.c.bf16 %v538_v12, %v536_v9  ;;  %v542_v19 = vld [vmem:[#allocation5 + $0x38] sm:$0xff]  ;;  %493 = vrot.lane.b32.xlu0 %v488_v14, %s2485_s24  ;;  %495 = vrot.lane.b32.xlu1 %v490_v15, %s2485_s24  ;;  %v539_v22 = vld [vmem:[#allocation5 + $0x20] sm:$0xff]  ;;  %v541_v23 = vld [vmem:[#allocation5 + $0x30] sm:$0xff]  ;;  %v508_v24 = vsel %vm505_vm1, %v506_v7, %v507_v10  ;;  %v510_v25 = vsel %vm505_vm1, %v507_v10, %v509_v11  ;;  %vm525_vm2 = vcmask 261120   ;;  %s2488_s15 = smov 52   ;;  %s2489_s1 = smov 90  }
  0xcb   : > { %v1894_v26 = vpack.c.bf16 %v537_v17, %v535_v13  ;;  %v1896_v27 = vpack.c.bf16 %v542_v19, %v540_v18  ;;  %v544_v28 = vld [vmem:[#allocation5 + $0x48] sm:$0xff]  ;;  %v546_v29 = vld [vmem:[#allocation5 + $0x58] sm:$0xff]  ;;  %v1898_v30 = vpack.c.bf16 %v541_v23, %v539_v22  ;;  %v543_v31 = vld [vmem:[#allocation5 + $0x40] sm:$0xff]  ;;  %v492_v33 = vsel %vm485_vm0, %v489_v6, %v491_v20  ;;  %s2492_s27 = smov 96   ;;  %s3058_s14 = sld [smem:[#allocation21_spill]] }
  0xcc   : > { %1893 = vmatprep.subr.bf16.mxu0 %v1892_v16  ;;  %v545_v32 = vld [vmem:[#allocation5 + $0x50] sm:$0xff]  ;;  %v512_v34 = vsel %vm505_vm1, %v509_v11, %v511_v21  ;;  %v1900_v35 = vpack.c.bf16 %v546_v29, %v544_v28  ;;  %v548_v36 = vld [vmem:[#allocation5 + $0x68] sm:$0xff]  ;;  %v550_v37 = vld [vmem:[#allocation5 + $0x78] sm:$0xff]  ;;  %vm530_vm3 = vcmask 523264   ;;  %vm559_vm4 = vcmask 785408   ;;  %s3059_s11 = sld [smem:[#allocation22_spill]] }
  0xcd   : > { %1895 = vmatpush1.bf16.msra.mxu0 %v1894_v26  ;;  %v1902_v38 = vpack.c.bf16 %v545_v32, %v543_v31  ;;  %v547_v39 = vld [vmem:[#allocation5 + $0x60] sm:$0xff]  ;;  %v549_v40 = vld [vmem:[#allocation5 + $0x70] sm:$0xff]  ;;  %v1904_v41 = vpack.c.bf16 %v550_v37, %v548_v36  ;;  %v552_v42 = vld [vmem:[#allocation5 + $0x88] sm:$0xff]  ;;  %vm711_vm5 = vcmask 1040384   ;;  %vm713_vm6 = vcmask 1041408   ;;  %s1686_s13 = sshll.u32 %s2575_s23, 4 }
  0xce   : > { %513 = vrot.lane.b32.xlu0 %v508_v24, %s2486_s12  ;;  %515 = vrot.lane.b32.xlu1 %v510_v25, %s2486_s12  ;;  %v554_v43 = vld [vmem:[#allocation5 + $0x98] sm:$0xff]  ;;  %v1906_v44 = vpack.c.bf16 %v549_v40, %v547_v39  ;;  %v551_v46 = vld [vmem:[#allocation5 + $0x80] sm:$0xff]  ;;  %v553_v47 = vld [vmem:[#allocation5 + $0x90] sm:$0xff]  ;;  %vm715_vm7 = vcmask 1042432   ;;  %vm717_vm8 = vcmask 1043456   ;;  %vm719_vm9 = vcmask 1044480  }
  0xcf   : > { %1897 = vmatprep.subr.bf16.mxu0 %v1896_v27  ;;  %v1908_v45 = vpack.c.bf16 %v554_v43, %v552_v42  ;;  %v556_v48 = vld [vmem:[#allocation5 + $0xa8] sm:$0xff]  ;;  %v558_v49 = vld [vmem:[#allocation5 + $0xb8] sm:$0xff]  ;;  %v1910_v50 = vpack.c.bf16 %v553_v47, %v551_v46  ;;  %v555_v52 = vld [vmem:[#allocation5 + $0xa0] sm:$0xff]  ;;  %vm2487_vm10 = vmmov 1   ;;  %vm763_vm12 = vcmask 424960   ;;  %s3060_s28 = sld [smem:[#allocation23_spill]] }
  0xd0   : > { %v1912_v51 = vpack.c.bf16 %v558_v49, %v556_v48  ;;  %v557_v53 = vld [vmem:[#allocation5 + $0xb0] sm:$0xff]  ;;  %v769_v10 = vld [vmem:[#allocation7 + $0x18] sm:$0xff]  ;;  %v766_v11 = vld [vmem:[#allocation7] sm:$0xff]  ;;  %vm760_vm13 = vcmask 736256   ;;  %vm834_vm14 = vcmask 113664   ;;  %vm2491_vm15 = vmmov 0  }
  0xd1   : > { %1899 = vmatpush1.bf16.msra.mxu0 %v1898_v30  ;;  %v1914_v54 = vpack.c.bf16 %v557_v53, %v555_v52  ;;  %v768_v13 = vld [vmem:[#allocation7 + $0x10] sm:$0xff]  ;;  %v771_v14 = vld [vmem:[#allocation7 + $0x28] sm:$0xff]  ;;  %v773_v15 = vld [vmem:[#allocation7 + $0x38] sm:$0xff]  ;;  %s1532_s30 = scalar_lea.sflag [#allocation4], %s2799_s3  ;;  %p3061_p7 = scmp.ne.s32.totalorder %s3046_s25, 0 }
  0xd2   : > { %497 = vrot.lane.b32.xlu0 %v492_v33, %s2485_s24  ;;  %517 = vrot.lane.b32.xlu1 %v512_v34, %s2486_s12  ;;  %v1918_v16 = vpack.c.bf16 %v768_v13, %v766_v11  ;;  %v1920_v17 = vpack.c.bf16 %v773_v15, %v771_v14  ;;  %v770_v18 = vld [vmem:[#allocation7 + $0x20] sm:$0xff]  ;;  %v772_v19 = vld [vmem:[#allocation7 + $0x30] sm:$0xff]  ;;  %v779_v25 = vld [vmem:[#allocation7 + $0x68] sm:$0xff]  ;;  %s2493_s23 = smov [#allocation13]  }
  0xd3   : > { %1901 = vmatprep.subr.bf16.mxu0 %v1900_v35  ;;  %v774_v23 = vld [vmem:[#allocation7 + $0x40] sm:$0xff]  ;;  %v776_v24 = vld [vmem:[#allocation7 + $0x50] sm:$0xff]  ;;  %v781_v26 = vld [vmem:[#allocation7 + $0x78] sm:$0xff]  ;;  %s2398_s29 = sshll.u32 %s2493_s23, 4  ;;  %s2399_s29 = int_to_ptr.vmem [resolvable:$false] %s2398_s29 }
  0xd4   : > { %v1926_v27 = vpack.c.bf16 %v776_v24, %v774_v23  ;;  %v1928_v28 = vpack.c.bf16 %v781_v26, %v779_v25  ;;  %v778_v29 = vld [vmem:[#allocation7 + $0x60] sm:$0xff]  ;;  %v780_v30 = vld [vmem:[#allocation7 + $0x70] sm:$0xff]  ;;  %v783_v31 = vld [vmem:[#allocation7 + $0x88] sm:$0xff] }
  0xd5   : > { %1903 = vmatpush1.bf16.msra.mxu0 %v1902_v38  ;;  %v785_v32 = vld [vmem:[#allocation7 + $0x98] sm:$0xff]  ;;  %v1930_v33 = vpack.c.bf16 %v780_v30, %v778_v29  ;;  %v782_v35 = vld [vmem:[#allocation7 + $0x80] sm:$0xff]  ;;  %v784_v36 = vld [vmem:[#allocation7 + $0x90] sm:$0xff]  ;;  %s2966_s22 = scalar_lea.hbm %s3060_s28, %s1686_s13 }
  0xd6   : > { %499 = vrot.lane.b32.xlu0 %v491_v20, %s2485_s24  ;;  %519 = vrot.lane.b32.xlu1 %v511_v21, %s2486_s12  ;;  %v777_v20 = vld [vmem:[#allocation7 + $0x58] sm:$0xff]  ;;  %v1922_v21 = vpack.c.bf16 %v772_v19, %v770_v18  ;;  %v1932_v34 = vpack.c.bf16 %v785_v32, %v783_v31  ;;  %v787_v37 = vld [vmem:[#allocation7 + $0xa8] sm:$0xff]  ;;  %v1934_v39 = vpack.c.bf16 %v784_v36, %v782_v35  ;;  %v788_v42 = vld [vmem:[#allocation7 + $0xb0] sm:$0xff] }
  0xd7   : > { %1905 = vmatprep.subr.bf16.mxu0 %v1904_v41  ;;  %v789_v38 = vld [vmem:[#allocation7 + $0xb8] sm:$0xff]  ;;  %v786_v41 = vld [vmem:[#allocation7 + $0xa0] sm:$0xff]  ;;  %v791_v43 = vld [vmem:[#allocation7 + $0xc8] sm:$0xff] }
  0xd8   : > { %v1936_v40 = vpack.c.bf16 %v789_v38, %v787_v37  ;;  %v790_v47 = vld [vmem:[#allocation7 + $0xc0] sm:$0xff]  ;;  %v792_v48 = vld [vmem:[#allocation7 + $0xd0] sm:$0xff]  ;;  %v795_v49 = vld [vmem:[#allocation7 + $0xe8] sm:$0xff] }
  0xd9   : > { %1907 = vmatpush1.bf16.msra.mxu0 %v1906_v44  ;;  %v793_v44 = vld [vmem:[#allocation7 + $0xd8] sm:$0xff]  ;;  %v794_v53 = vld [vmem:[#allocation7 + $0xe0] sm:$0xff]  ;;  %v811_v11 = vld [vmem:[#allocation7 + $0x168] sm:$0xff] }
  0xda   : > { %1909 = vmatprep.subr.bf16.mxu0 %v1908_v45  ;;  %v1938_v45 = vpack.c.bf16 %v788_v42, %v786_v41  ;;  %v1940_v46 = vpack.c.bf16 %v793_v44, %v791_v43  ;;  %v810_v15 = vld [vmem:[#allocation7 + $0x160] sm:$0xff]  ;;  %v817_v18 = vld [vmem:[#allocation7 + $0x198] sm:$0xff]  ;;  %vm2884_vm11 = vmpackc.low %vm505_vm1, %vm2487_vm10 }
  0xdb   : > { %v821_v23 = vld [vmem:[#allocation7 + $0x1b8] sm:$0xff]  ;;  %v818_v26 = vld [vmem:[#allocation7 + $0x1a0] sm:$0xff] }
  0xdc   : > { %v825_v29 = vld [vmem:[#allocation7 + $0x1d8] sm:$0xff]  ;;  %v822_v32 = vld [vmem:[#allocation7 + $0x1c0] sm:$0xff] }
  0xdd   : > { %1911 = vmatpush1.bf16.msra.mxu0 %v1910_v50  ;;  %v797_v50 = vld [vmem:[#allocation7 + $0xf8] sm:$0xff]  ;;  %v826_v38 = vld [vmem:[#allocation7 + $0x1e0] sm:$0xff] }
  0xde   : > { %1913 = vmatprep.subr.bf16.mxu0 %v1912_v51  ;;  %v1942_v51 = vpack.c.bf16 %v792_v48, %v790_v47  ;;  %v1944_v52 = vpack.c.bf16 %v797_v50, %v795_v49  ;;  %v829_v35 = vld [vmem:[#allocation7 + $0x1f8] sm:$0xff] }
  0xe1   : > { %1915 = vmatpush1.bf16.msra.mxu0 %v1914_v54  ;;  %v796_v54 = vld [vmem:[#allocation7 + $0xf0] sm:$0xff] }
 0x13c   : > { %v494_v55 = vpop.permute.xlu0 %493  ;;  %v496_v56 = vpop.permute.xlu1 %495 }
 0x13d   : > { %v526_v57 = vsel %vm525_vm2, %v2820_v1, %v494_v55  ;;  %v527_v61 = vsel %vm525_vm2, %v2822_v2, %v496_v56  ;;  %v799_v55 = vld [vmem:[#allocation7 + $0x108] sm:$0xff]  ;;  %v801_v56 = vld [vmem:[#allocation7 + $0x118] sm:$0xff] }
 0x140   : > { %v514_v58 = vpop.permute.xlu0 %513  ;;  %v516_v59 = vpop.permute.xlu1 %515 }
 0x141   : > { %v531_v60 = vsel %vm530_vm3, %v526_v57, %v514_v58  ;;  %v532_v4 = vsel %vm530_vm3, %v527_v61, %v516_v59  ;;  %v1946_v57 = vpack.c.bf16 %v796_v54, %v794_v53  ;;  %v1948_v58 = vpack.c.bf16 %v801_v56, %v799_v55  ;;  %v798_v59 = vld [vmem:[#allocation7 + $0x100] sm:$0xff]  ;;  %v803_v61 = vld [vmem:[#allocation7 + $0x128] sm:$0xff] }
 0x142   : > { %1676 = vmatmul.mubr.msk.f32.vlgmr.msra.gmra.mrb[0].mxu0 %vm559_vm4, %v531_v60  ;;  %v800_v60 = vld [vmem:[#allocation7 + $0x110] sm:$0xff] }
 0x143   : > { %642 = vmatprep.mubr.f32.mxu0 %v2484_v0 }
 0x144   : > { %v498_v62 = vpop.permute.xlu0 %497  ;;  %v518_v63 = vpop.permute.xlu1 %517 }
 0x145   : > { %v528_v5 = vsel %vm525_vm2, %v2824_v3, %v498_v62  ;;  %v767_v3 = vld [vmem:[#allocation7 + $0x8] sm:$0xff]  ;;  %v805_v62 = vld [vmem:[#allocation7 + $0x138] sm:$0xff] }
 0x146   : > { %1677 = vmatmul.mubr.msk.f32.gmra.mrb[2].mxu0 %vm559_vm4, %v532_v4  ;;  %v533_v1 = vsel %vm530_vm3, %v528_v5, %v518_v63  ;;  %v1916_v12 = vpack.c.bf16 %v769_v10, %v767_v3  ;;  %v1950_v63 = vpack.c.bf16 %v800_v60, %v798_v59  ;;  %v1952_v4 = vpack.c.bf16 %v805_v62, %v803_v61  ;;  %v802_v5 = vld [vmem:[#allocation7 + $0x120] sm:$0xff]  ;;  %v808_v10 = vld [vmem:[#allocation7 + $0x150] sm:$0xff] }
 0x147   : > { %648 = vmatprep.mubr.f32.mxu0 %v2484_v0  ;;  %v806_v3 = vld [vmem:[#allocation7 + $0x140] sm:$0xff] }
 0x148   : > { %v500_v6 = vpop.permute.xlu0 %499  ;;  %v520_v7 = vpop.permute.xlu1 %519  ;;  %1917 = vmatprep.subr.bf16.mxu1 %v1916_v12  ;;  %v813_v12 = vld [vmem:[#allocation7 + $0x178] sm:$0xff]  ;;  %v1958_v13 = vpack.c.bf16 %v808_v10, %v806_v3 }
 0x149   : > { %v529_v2 = vsel %vm525_vm2, %v2830_v8, %v500_v6  ;;  %v775_v8 = vld [vmem:[#allocation7 + $0x48] sm:$0xff]  ;;  %1919 = vmatpush1.bf16.msra.mxu1 %v1918_v16  ;;  %v1960_v14 = vpack.c.bf16 %v813_v12, %v811_v11  ;;  %v812_v16 = vld [vmem:[#allocation7 + $0x170] sm:$0xff] }
 0x14a   : > { %1678 = vmatmul.mubr.msk.f32.gmra.mrb[4].mxu0 %vm559_vm4, %v533_v1  ;;  %v534_v9 = vsel %vm530_vm3, %v529_v2, %v520_v7  ;;  %1921 = vmatprep.subr.bf16.mxu1 %v1920_v17  ;;  %v1924_v22 = vpack.c.bf16 %v777_v20, %v775_v8  ;;  %v804_v1 = vld [vmem:[#allocation7 + $0x130] sm:$0xff]  ;;  %v807_v6 = vld [vmem:[#allocation7 + $0x148] sm:$0xff]  ;;  %v809_v7 = vld [vmem:[#allocation7 + $0x158] sm:$0xff]  ;;  %v1962_v19 = vpack.c.bf16 %v812_v16, %v810_v15 }
 0x14b   : > { %654 = vmatprep.mubr.f32.mxu0 %v2484_v0  ;;  %v1954_v2 = vpack.c.bf16 %v804_v1, %v802_v5  ;;  %v815_v17 = vld [vmem:[#allocation7 + $0x188] sm:$0xff]  ;;  %v814_v20 = vld [vmem:[#allocation7 + $0x180] sm:$0xff] }
 0x14c   : > { %v1964_v8 = vpack.c.bf16 %v817_v18, %v815_v17  ;;  %v1680_v15 = vld [vmem:[%s3012_s2] ss:$0 sm:$0xff] }
 0x14d   : > { %1923 = vmatpush1.bf16.msra.mxu1 %v1922_v21  ;;  %v816_v21 = vld [vmem:[#allocation7 + $0x190] sm:$0xff] }
 0x14e   : > { %1679 = vmatmul.mubr.msk.f32.gmra.mrb[6].mxu0 %vm559_vm4, %v534_v9  ;;  %1925 = vmatprep.subr.bf16.mxu1 %v1924_v22  ;;  %v1956_v9 = vpack.c.bf16 %v809_v7, %v807_v6  ;;  %v819_v22 = vld [vmem:[#allocation7 + $0x1a8] sm:$0xff]  ;;  %v1966_v24 = vpack.c.bf16 %v816_v21, %v814_v20  ;;  %v833_v21 = vld [vmem:[#allocation7 + $0x218] sm:$0x3f] }
 0x14f   : > { %v1968_v25 = vpack.c.bf16 %v821_v23, %v819_v22  ;;  %v831_v20 = vld [vmem:[#allocation7 + $0x208] sm:$0xff] }
 0x151   : > { %1927 = vmatpush1.bf16.msra.mxu1 %v1926_v27  ;;  %v820_v27 = vld [vmem:[#allocation7 + $0x1b0] sm:$0xff] }
 0x152   : > { %1929 = vmatprep.subr.bf16.mxu1 %v1928_v28  ;;  %v823_v28 = vld [vmem:[#allocation7 + $0x1c8] sm:$0xff]  ;;  %v1970_v30 = vpack.c.bf16 %v820_v27, %v818_v26  ;;  %v1078_v27 = vld [vmem:[#allocation8 + $0x50] sm:$0xff] }
 0x153   : > { %v1972_v31 = vpack.c.bf16 %v825_v29, %v823_v28 }
 0x155   : > { %1931 = vmatpush1.bf16.msra.mxu1 %v1930_v33  ;;  %v824_v33 = vld [vmem:[#allocation7 + $0x1d0] sm:$0xff] }
 0x156   : > { %1933 = vmatprep.subr.bf16.mxu1 %v1932_v34  ;;  %v827_v34 = vld [vmem:[#allocation7 + $0x1e8] sm:$0xff]  ;;  %v1974_v36 = vpack.c.bf16 %v824_v33, %v822_v32 }
 0x157   : > { %v1976_v37 = vpack.c.bf16 %v829_v35, %v827_v34 }
 0x159   : > { %1935 = vmatpush1.bf16.msra.mxu1 %v1934_v39  ;;  %v828_v39 = vld [vmem:[#allocation7 + $0x1f0] sm:$0xff] }
 0x15a   : > { %1937 = vmatprep.subr.bf16.mxu1 %v1936_v40  ;;  %v1978_v40 = vpack.c.bf16 %v828_v39, %v826_v38  ;;  %v830_v39 = vld [vmem:[#allocation7 + $0x200] sm:$0xff] }
 0x15d   : > { %1939 = vmatpush1.bf16.msra.mxu1 %v1938_v45 }
 0x15e   : > { %1941 = vmatprep.subr.bf16.mxu1 %v1940_v46 }
 0x161   : > { %1943 = vmatpush1.bf16.msra.mxu1 %v1942_v51 }
 0x162   : > { %1945 = vmatprep.subr.bf16.mxu1 %v1944_v52 }
 0x165   : > { %1947 = vmatpush1.bf16.msra.mxu1 %v1946_v57 }
 0x166   : > { %1949 = vmatprep.subr.bf16.mxu1 %v1948_v58 }
 0x169   : > { %1951 = vmatpush1.bf16.msra.mxu1 %v1950_v63 }
 0x16a   : > { %1953 = vmatprep.subr.bf16.mxu1 %v1952_v4 }
 0x16d   : > { %1955 = vmatpush1.bf16.msra.mxu1 %v1954_v2 }
 0x16e   : > { %1957 = vmatprep.subr.bf16.mxu1 %v1956_v9 }
 0x171   : > { %1959 = vmatpush1.bf16.msra.mxu1 %v1958_v13 }
 0x172   : > { %1961 = vmatprep.subr.bf16.mxu1 %v1960_v14 }
 0x175   : > { %1963 = vmatpush1.bf16.msra.mxu1 %v1962_v19 }
 0x176   : > { %1965 = vmatprep.subr.bf16.mxu1 %v1964_v8 }
 0x179   : > { %1967 = vmatpush1.bf16.msra.mxu1 %v1966_v24  ;;  %v1980_v24 = vpack.c.bf16 %v833_v21, %v831_v20  ;;  %v1076_v21 = vld [vmem:[#allocation8 + $0x40] sm:$0xff] }
 0x17a   : > { %1969 = vmatprep.subr.bf16.mxu1 %v1968_v25 }
 0x17d   : > { %1971 = vmatpush1.bf16.msra.mxu1 %v1970_v30 }
 0x17e   : > { %1973 = vmatprep.subr.bf16.mxu1 %v1972_v31 }
 0x181   : > { %1975 = vmatpush1.bf16.msra.mxu1 %v1974_v36 }
 0x182   : > { %1977 = vmatprep.subr.bf16.mxu1 %v1976_v37 }
 0x185   : > { %1979 = vmatpush1.bf16.msra.mxu1 %v1978_v40  ;;  %v832_v40 = vld [vmem:[#allocation7 + $0x210] sm:$0x3f] }
 0x186   : > { %1982 = vmatprep.subr.msk.bf16.mxu1 %vm2884_vm11, %v1980_v24  ;;  %v1095_v24 = vld [vmem:[#allocation8 + $0xd8] sm:$0xff] }
 0x215   : > { %v638_v41 = vpop.f32.mrb[0].mxu0 }
 0x216   : > { %v640_v42 = vpop.f32.mrb[1].mxu0 }
 0x217   : > { %v661_v43 = vmax.f32 %v638_v41, %v640_v42 }
 0x219   : > { %v666_v44 = vrot.slane %v661_v43, 1  ;;  %v644_v45 = vpop.f32.mrb[2].mxu0 }
 0x21a   : > { %v646_v46 = vpop.f32.mrb[3].mxu0 }
 0x21b   : > { %v668_v47 = vmax.f32 %v661_v43, %v666_v44  ;;  %v662_v48 = vmax.f32 %v644_v45, %v646_v46  ;;  %v1983_v43 = vpack.c.bf16 %v832_v40, %v830_v39  ;;  %v1136_v39 = vld [vmem:[#allocation8 + $0x220] sm:$0xff]  ;;  %v1137_v40 = vld [vmem:[#allocation8 + $0x228] sm:$0xff] }
 0x21d   : > { %v682_v49 = vrot.slane %v668_v47, 1  ;;  %v684_v50 = vrot.slane %v668_v47, 2  ;;  %v670_v51 = vrot.slane %v662_v48, 1  ;;  %v650_v52 = vpop.f32.mrb[4].mxu0  ;;  %v686_v54 = vrot.slane %v668_v47, 3 }
 0x21e   : > { %v652_v53 = vpop.f32.mrb[5].mxu0 }
 0x21f   : > { %v712_v55 = vsel %vm711_vm5, %v668_v47, %v682_v49  ;;  %v672_v56 = vmax.f32 %v662_v48, %v670_v51  ;;  %v663_v57 = vmax.f32 %v650_v52, %v652_v53  ;;  %v1085_v51 = vld [vmem:[#allocation8 + $0x88] sm:$0xff]  ;;  %v1068_v52 = vld [vmem:[#allocation8] sm:$0xff] }
 0x220   : > { %v714_v58 = vsel %vm713_vm6, %v712_v55, %v684_v50  ;;  %v1084_v50 = vld [vmem:[#allocation8 + $0x80] sm:$0xff]  ;;  %v1086_v55 = vld [vmem:[#allocation8 + $0x90] sm:$0xff] }
 0x221   : > { %v716_v59 = vsel %vm715_vm7, %v714_v58, %v686_v54  ;;  %v689_v60 = vrot.slane %v672_v56, 4  ;;  %v691_v61 = vrot.slane %v672_v56, 5  ;;  %v656_v62 = vpop.f32.mrb[6].mxu0  ;;  %v674_v63 = vrot.slane %v663_v57, 1  ;;  %v1069_v54 = vld [vmem:[#allocation8 + $0x8] sm:$0xff] }
 0x222   : > { %v658_v4 = vpop.f32.mrb[7].mxu0  ;;  %v693_v5 = vrot.slane %v672_v56, 6  ;;  %v695_v7 = vrot.slane %v672_v56, 7  ;;  %v1986_v53 = vpack.c.bf16 %v1085_v51, %v1084_v50  ;;  %v1087_v56 = vld [vmem:[#allocation8 + $0x98] sm:$0xff]  ;;  %v1988_v58 = vpack.c.bf16 %v1069_v54, %v1068_v52 }
 0x223   : > { %v664_v1 = vmax.f32 %v656_v62, %v658_v4  ;;  %v718_v6 = vsel %vm717_vm8, %v716_v59, %v689_v60  ;;  %v676_v2 = vmax.f32 %v663_v57, %v674_v63  ;;  %v2490_v57 = vmov 0.0|0.0   ;;  %v1070_v60 = vld [vmem:[#allocation8 + $0x10] sm:$0xff]  ;;  %v1088_v62 = vld [vmem:[#allocation8 + $0xa0] sm:$0xff]  ;;  %v1089_v63 = vld [vmem:[#allocation8 + $0xa8] sm:$0xff] }
 0x224   : > { %v720_v9 = vsel %vm719_vm9, %v718_v6, %v691_v61  ;;  %v1990_v59 = vpack.c.bf16 %v1087_v56, %v1086_v55  ;;  %v1071_v61 = vld [vmem:[#allocation8 + $0x18] sm:$0xff]  ;;  %1987 = vmatprep.subr.bf16.mxu0 %v1986_v53  ;;  %v1073_v6 = vld [vmem:[#allocation8 + $0x28] sm:$0xff] }
 0x225   : > { %v678_v3 = vrot.slane %v664_v1, 1  ;;  %v721_v10 = vsel %vm505_vm1, %v720_v9, %v693_v5  ;;  %v698_v11 = vrot.slane %v676_v2, 1  ;;  %v700_v12 = vrot.slane %v676_v2, 2  ;;  %1989 = vmatpush3.bf16.msra.mxu0 %v1988_v58  ;;  %v1132_v9 = vld [vmem:[#allocation8 + $0x200] sm:$0xff]  ;;  %v1139_v51 = vld [vmem:[#allocation8 + $0x238] sm:$0xff] }
 0x226   : > { %v722_v13 = vsel %vm485_vm0, %v721_v10, %v695_v7  ;;  %v702_v16 = vrot.slane %v676_v2, 3  ;;  %v1992_v4 = vpack.c.bf16 %v1071_v61, %v1070_v60  ;;  %1991 = vmatprep.subr.bf16.mxu0 %v1990_v59  ;;  %v1994_v5 = vpack.c.bf16 %v1089_v63, %v1088_v62  ;;  %v1090_v7 = vld [vmem:[#allocation8 + $0xb0] sm:$0xff] }
 0x227   : > { %v680_v14 = vmax.f32 %v664_v1, %v678_v3  ;;  %v723_v17 = vsel %vm711_vm5, %v676_v2, %v698_v11  ;;  %v736_v23 = vadd.f32 %v1680_v15, %v722_v13  ;;  %v1072_v1 = vld [vmem:[#allocation8 + $0x20] sm:$0xff]  ;;  %v1091_v2 = vld [vmem:[#allocation8 + $0xb8] sm:$0xff]  ;;  %v1133_v3 = vld [vmem:[#allocation8 + $0x208] sm:$0xff] }
 0x228   : > { %v724_v18 = vsel %vm713_vm6, %v723_v17, %v700_v12  ;;  %v1996_v10 = vpack.c.bf16 %v1073_v6, %v1072_v1  ;;  %v1074_v11 = vld [vmem:[#allocation8 + $0x30] sm:$0xff]  ;;  %v2051_v12 = vpack.c.bf16 %v1133_v3, %v1132_v9  ;;  %v1998_v13 = vpack.c.bf16 %v1091_v2, %v1090_v7  ;;  %v1092_v17 = vld [vmem:[#allocation8 + $0xc0] sm:$0xff] }
 0x229   : > { %v705_v19 = vrot.slane %v680_v14, 4  ;;  %v707_v8 = vrot.slane %v680_v14, 5  ;;  %v725_v22 = vsel %vm715_vm7, %v724_v18, %v702_v16  ;;  %v709_v25 = vrot.slane %v680_v14, 6  ;;  %1993 = vmatpush3.bf16.msra.mxu0 %v1992_v4  ;;  %v1075_v14 = vld [vmem:[#allocation8 + $0x38] sm:$0xff]  ;;  %v1093_v18 = vld [vmem:[#allocation8 + $0xc8] sm:$0xff] }
 0x22a   : > { %v738_v31 = vmax.f32 %v736_v23, 0.0  ;;  %1995 = vmatprep.subr.bf16.mxu0 %v1994_v5  ;;  %v1135_v16 = vld [vmem:[#allocation8 + $0x218] sm:$0xff]  ;;  %v2002_v20 = vpack.c.bf16 %v1093_v18, %v1092_v17  ;;  %v1094_v23 = vld [vmem:[#allocation8 + $0xd0] sm:$0xff]  ;;  %v1033_v1 = vlaneseq  ;;  %v2914_v9 = vld [vmem:[%s3014_s4] sm:$0x1f] }
 0x22b   : > { %v726_v26 = vsel %vm717_vm8, %v725_v22, %v705_v19  ;;  %v1077_v22 = vld [vmem:[#allocation8 + $0x48] sm:$0xff]  ;;  %v1100_v18 = vld [vmem:[#allocation8 + $0x100] sm:$0xff] }
 0x22c   : > { %v727_v28 = vsel %vm719_vm9, %v726_v26, %v707_v8  ;;  %v751_v33 = vrot.slane %v738_v31, 2  ;;  %v742_v35 = vrot.slane %v738_v31, 1  ;;  %v2000_v8 = vpack.c.bf16 %v1075_v14, %v1074_v11 }
 0x22d   : > { %v728_v29 = vsel %vm505_vm1, %v727_v28, %v709_v25  ;;  %1997 = vmatpush3.bf16.msra.mxu0 %v1996_v10  ;;  %v2004_v25 = vpack.c.bf16 %v1077_v22, %v1076_v21  ;;  %v2006_v26 = vpack.c.bf16 %v1095_v24, %v1094_v23  ;;  %v1079_v28 = vld [vmem:[#allocation8 + $0x58] sm:$0xff]  ;;  %v2907_v6 = vshrl.u32 %v1033_v1, 7  ;;  %v1118_v22 = vld [vmem:[#allocation8 + $0x190] sm:$0xff]  ;;  %v1112_v1 = vld [vmem:[#allocation8 + $0x160] sm:$0xff] }
 0x22e   : > { %v737_v30 = vadd.f32 %v1680_v15, %v728_v29  ;;  %v1134_v15 = vld [vmem:[#allocation8 + $0x210] sm:$0xff]  ;;  %1999 = vmatprep.subr.bf16.mxu0 %v1998_v13  ;;  %v1096_v29 = vld [vmem:[#allocation8 + $0xe0] sm:$0xff]  ;;  %v1119_v23 = vld [vmem:[#allocation8 + $0x198] sm:$0xff] }
 0x22f   : > { %v2054_v19 = vpack.c.bf16 %v1135_v16, %v1134_v15  ;;  %v1035_v7 = vsub.s32 0, %v2907_v6  ;;  %v1039_v2 = vsub.s32 1, %v2907_v6  ;;  %v1051_v3 = vsub.s32 4, %v2907_v6 }
 0x230   : > { %v739_v32 = vmax.f32 %v737_v30, 0.0  ;;  %v1097_v30 = vld [vmem:[#allocation8 + $0xe8] sm:$0xff] }
 0x231   : > { %2001 = vmatpush3.bf16.msra.mxu0 %v2000_v8  ;;  %v1036_v10 = vrot.slane %v2914_v9, %v1035_v7  ;;  %v1040_v11 = vrot.slane %v2914_v9, %v1039_v2  ;;  %v1052_v17 = vrot.slane %v2914_v9, %v1051_v3  ;;  %v1113_v7 = vld [vmem:[#allocation8 + $0x168] sm:$0xff]  ;;  %v1130_v2 = vld [vmem:[#allocation8 + $0x1f0] sm:$0xff]  ;;  %v1131_v3 = vld [vmem:[#allocation8 + $0x1f8] sm:$0xff] }
 0x232   : > { %v752_v34 = vrot.slane %v739_v32, 2  ;;  %v743_v36 = vrot.slane %v739_v32, 1  ;;  %2003 = vmatprep.subr.bf16.mxu0 %v2002_v20 }
 0x234   : > { %v753_v37 = vsel %vm505_vm1, %v751_v33, %v752_v34  ;;  %v744_v38 = vsel %vm485_vm0, %v742_v35, %v743_v36  ;;  %v1080_v33 = vld [vmem:[#allocation8 + $0x60] sm:$0xff] }
 0x235   : > { %754 = vrot.lane.b32.xlu1 %v753_v37, %s2488_s15  ;;  %745 = vrot.lane.b32.xlu0 %v744_v38, %s2489_s1  ;;  %v1099_v37 = vld [vmem:[#allocation8 + $0xf8] sm:$0xff] }
 0x236   : > { %2005 = vmatpush3.bf16.msra.mxu0 %v2004_v25 }
 0x237   : > { %2007 = vmatprep.subr.bf16.mxu0 %v2006_v26 }
 0x239   : > { %756 = vrot.lane.b32.xlu1 %v752_v34, %s2488_s15  ;;  %747 = vrot.lane.b32.xlu0 %v743_v36, %s2489_s1  ;;  %v1081_v34 = vld [vmem:[#allocation8 + $0x68] sm:$0xff]  ;;  %v1098_v36 = vld [vmem:[#allocation8 + $0xf0] sm:$0xff]  ;;  %s476_s15 = scalar_lea.vmem [#allocation13], %s2799_s3 }
 0x23a   : > { %v2012_v35 = vpack.c.bf16 %v1081_v34, %v1080_v33  ;;  %v2014_v38 = vpack.c.bf16 %v1099_v37, %v1098_v36  ;;  %v1120_v34 = vld [vmem:[#allocation8 + $0x1a0] sm:$0xff]  ;;  %s1544_s1 = sshll.u32 %s476_s15, 4  ;;  %s2968_s1 = int_to_ptr.vmem [resolvable:$true] %s1544_s1 }
 0x23b   : > { %s2394_s10 = scalar_lea.vmem %s2968_s1, 16  ;;  %p2401_p11 = scmp.lt.s32.totalorder %s2968_s1, %s2399_s29 }
 0x23c   : > { %p2395_p2 = scmp.ne.s32.totalorder %s2968_s1, %s2394_s10 }
 0x23e   : > { %p2396_p10 = pnand %p2395_p2, %p3061_p7 }
 0x240   : > { %p2397_p1 = pneg %p2396_p10 }
 0x2a7   : > { %v755_v41 = vpop.permute.xlu1 %754  ;;  %v746_v42 = vpop.permute.xlu0 %745 }
 0x2a8   : > { %v764_v44 = vsel %vm763_vm12, %v746_v42, %v755_v41  ;;  %v761_v45 = vsel %vm760_vm13, %v738_v31, %v746_v42  ;;  %v2008_v31 = vpack.c.bf16 %v1079_v28, %v1078_v27  ;;  %v2057_v42 = vpack.c.bf16 %v1137_v40, %v1136_v39  ;;  %v1104_v40 = vld [vmem:[#allocation8 + $0x120] sm:$0xff] }
 0x2a9   : > { %909 = vmatprep.mubr.f32.mxu1 %v764_v44 }
 0x2aa   : > { %910 = vmatmul.mubr.f32.vlgmr.msra.gmra.mrb[0].mxu1 %v761_v45  ;;  %2009 = vmatpush3.bf16.msra.mxu0 %v2008_v31  ;;  %v1102_v31 = vld [vmem:[#allocation8 + $0x110] sm:$0xff] }
 0x2ab   : > { %1985 = vmatpush1.bf16.msk.msra.mxu1 %vm2884_vm11, %v1983_v43  ;;  %v757_v46 = vpop.permute.xlu1 %756  ;;  %v748_v47 = vpop.permute.xlu0 %747  ;;  %v1083_v43 = vld [vmem:[#allocation8 + $0x78] sm:$0xff] }
 0x2ac   : > { %v765_v48 = vsel %vm763_vm12, %v748_v47, %v757_v46  ;;  %v762_v49 = vsel %vm760_vm13, %v739_v32, %v748_v47  ;;  %2050 = vmatprep.subr.bf16.mxu1 %v2490_v57  ;;  %v2010_v32 = vpack.c.bf16 %v1097_v30, %v1096_v29  ;;  %v1117_v47 = vld [vmem:[#allocation8 + $0x188] sm:$0xff]  ;;  %v2022_v30 = vpack.c.bf16 %v1119_v23, %v1118_v22  ;;  %v1358_v22 = vld [vmem:[#allocation10 + $0x18] sm:$0xff] }
 0x2ad   : > { %915 = vmatprep.mubr.f32.mxu1 %v765_v48  ;;  %v1138_v48 = vld [vmem:[#allocation8 + $0x230] sm:$0xff] }
 0x2ae   : > { %916 = vmatmul.mubr.f32.gmra.mrb[2].mxu1 %v762_v49  ;;  %2011 = vmatprep.subr.bf16.mxu0 %v2010_v32  ;;  %v2060_v53 = vpack.c.bf16 %v1139_v51, %v1138_v48  ;;  %v1103_v32 = vld [vmem:[#allocation8 + $0x118] sm:$0xff]  ;;  %v1124_v48 = vld [vmem:[#allocation8 + $0x1c0] sm:$0xff] }
 0x2af   : > { %986 = vmatprep.mubr.f32.mxu1 %v2484_v0  ;;  %2013 = vmatpush3.bf16.msra.mxu0 %v2012_v35  ;;  %v1121_v35 = vld [vmem:[#allocation8 + $0x1a8] sm:$0xff] }
 0x2b0   : > { %2015 = vmatprep.subr.bf16.mxu0 %v2014_v38  ;;  %v2024_v38 = vpack.c.bf16 %v1103_v32, %v1102_v31  ;;  %v2026_v39 = vpack.c.bf16 %v1121_v35, %v1120_v34  ;;  %v1365_v31 = vld [vmem:[#allocation10 + $0x50] sm:$0xff]  ;;  %v1366_v32 = vld [vmem:[#allocation10 + $0x58] sm:$0xff]  ;;  %v1367_v34 = vld [vmem:[#allocation10 + $0x60] sm:$0xff] }
 0x2b1   : > { %v1368_v35 = vld [vmem:[#allocation10 + $0x68] sm:$0xff] }
 0x2b2   : > { %1683 = vmatmul.mubr.msk.f32.vlgmr.msra.gmra.mrb[0].mxu1 %vm834_vm14, %v755_v41  ;;  %v1082_v41 = vld [vmem:[#allocation8 + $0x70] sm:$0xff] }
 0x2b3   : > { %992 = vmatprep.mubr.f32.mxu1 %v2484_v0  ;;  %2052 = vmatpush3.bf16.msra.mxu1 %v2051_v12  ;;  %v2016_v44 = vpack.c.bf16 %v1083_v43, %v1082_v41  ;;  %v1047_v12 = vsub.s32 3, %v2907_v6  ;;  %v1105_v41 = vld [vmem:[#allocation8 + $0x128] sm:$0xff]  ;;  %v1123_v43 = vld [vmem:[#allocation8 + $0x1b8] sm:$0xff] }
 0x2b4   : > { %2053 = vmatprep.subr.bf16.mxu1 %v2490_v57 }
 0x2b5   : > { %2017 = vmatpush3.bf16.msra.mxu0 %v2016_v44  ;;  %v1048_v21 = vrot.slane %v2914_v9, %v1047_v12  ;;  %v2028_v44 = vpack.c.bf16 %v1105_v41, %v1104_v40  ;;  %v1443_v40 = vld [vmem:[#allocation11] sm:$0xff]  ;;  %v1444_v41 = vld [vmem:[#allocation11 + $0x8] sm:$0xff] }
 0x2b6   : > { %1684 = vmatmul.mubr.msk.f32.gmra.mrb[2].mxu1 %vm834_vm14, %v757_v46  ;;  %v1116_v46 = vld [vmem:[#allocation8 + $0x180] sm:$0xff] }
 0x2b7   : > { %2055 = vmatpush3.bf16.msra.mxu1 %v2054_v19  ;;  %v2018_v50 = vpack.c.bf16 %v1117_v47, %v1116_v46  ;;  %1819 = vmatprep.mubr.msk.f32.mxu1 %vm2491_vm15, %v2484_v0  ;;  %v1101_v19 = vld [vmem:[#allocation8 + $0x108] sm:$0xff]  ;;  %v1106_v46 = vld [vmem:[#allocation8 + $0x130] sm:$0xff]  ;;  %v1107_v47 = vld [vmem:[#allocation8 + $0x138] sm:$0xff] }
 0x2b8   : > { %2056 = vmatprep.subr.bf16.mxu1 %v2490_v57  ;;  %v2020_v27 = vpack.c.bf16 %v1101_v19, %v1100_v18 }
 0x2b9   : > { %2019 = vmatprep.subr.bf16.mxu0 %v2018_v50  ;;  %v2032_v50 = vpack.c.bf16 %v1107_v47, %v1106_v46  ;;  %v1447_v46 = vld [vmem:[#allocation11 + $0x20] sm:$0xff]  ;;  %v1448_v47 = vld [vmem:[#allocation11 + $0x28] sm:$0xff] }
 0x2bb   : > { %2058 = vmatpush3.bf16.msra.mxu1 %v2057_v42  ;;  %v1122_v42 = vld [vmem:[#allocation8 + $0x1b0] sm:$0xff] }
 0x2bc   : > { %2059 = vmatprep.subr.bf16.mxu1 %v2490_v57 }
 0x2bf   : > { %2061 = vmatpush3.bf16.msra.mxu1 %v2060_v53  ;;  %v1109_v53 = vld [vmem:[#allocation8 + $0x148] sm:$0xff] }
 0x2c0   : > { %2086 = vmatprep.subr.bf16.mxu1 %v2490_v57 }
 0x385   : > { %v988_v45 = vpop.f32.mrb[0].mxu1 }
 0x386   : > { %v990_v49 = vpop.f32.mrb[1].mxu1 }
 0x387   : > { %v999_v52 = vmax.f32 %v988_v45, %v990_v49  ;;  %v2030_v45 = vpack.c.bf16 %v1123_v43, %v1122_v42  ;;  %v1125_v49 = vld [vmem:[#allocation8 + $0x1c8] sm:$0xff]  ;;  %v1445_v42 = vld [vmem:[#allocation11 + $0x10] sm:$0xff]  ;;  %v2087_v43 = vpack.c.bf16 %v1444_v41, %v1443_v40 }
 0x388   : > { %v2034_v51 = vpack.c.bf16 %v1125_v49, %v1124_v48  ;;  %v2093_v48 = vpack.c.bf16 %v1448_v47, %v1447_v46  ;;  %v1449_v49 = vld [vmem:[#allocation11 + $0x30] sm:$0xff] }
 0x389   : > { %v1002_v54 = vrot.slane %v999_v52, 1  ;;  %v994_v55 = vpop.f32.mrb[2].mxu1 }
 0x38a   : > { %v996_v56 = vpop.f32.mrb[3].mxu1 }
 0x38b   : > { %v1004_v58 = vmax.f32 %v999_v52, %v1002_v54  ;;  %v1000_v59 = vmax.f32 %v994_v55, %v996_v56  ;;  %v1108_v52 = vld [vmem:[#allocation8 + $0x140] sm:$0xff]  ;;  %v1126_v54 = vld [vmem:[#allocation8 + $0x1d0] sm:$0xff]  ;;  %v1127_v55 = vld [vmem:[#allocation8 + $0x1d8] sm:$0xff] }
 0x38c   : > { %v2036_v56 = vpack.c.bf16 %v1109_v53, %v1108_v52  ;;  %v1451_v52 = vld [vmem:[#allocation11 + $0x40] sm:$0xff]  ;;  %v1452_v53 = vld [vmem:[#allocation11 + $0x48] sm:$0xff] }
 0x38d   : > { %v1006_v60 = vrot.slane %v1000_v59, 1  ;;  %v1014_v61 = vrot.slane %v1004_v58, 4  ;;  %v1010_v62 = vrot.slane %v1004_v58, 2  ;;  %v1018_v4 = vrot.slane %v1004_v58, 6 }
 0x38f   : > { %v1008_v63 = vmax.f32 %v1000_v59, %v1006_v60  ;;  %1015 = vrot.lane.b32.xlu1 %v1014_v61, %s2486_s12  ;;  %1011 = vrot.lane.b32.xlu0 %v1010_v62, %s2492_s27  ;;  %v1110_v59 = vld [vmem:[#allocation8 + $0x150] sm:$0xff]  ;;  %v1111_v60 = vld [vmem:[#allocation8 + $0x158] sm:$0xff]  ;;  %v1128_v61 = vld [vmem:[#allocation8 + $0x1e0] sm:$0xff] }
 0x390   : > { %v1129_v62 = vld [vmem:[#allocation8 + $0x1e8] sm:$0xff] }
 0x391   : > { %v1023_v5 = vrot.slane %v1008_v63, 2 }
 0x393   : > { %1019 = vrot.lane.b32.xlu1 %v1018_v4, %s2485_s24  ;;  %1024 = vrot.lane.b32.xlu0 %v1023_v5, %s2492_s27  ;;  %v1043_v4 = vsub.s32 2, %v2907_v6  ;;  %v2042_v5 = vpack.c.bf16 %v1129_v62, %v1128_v61 }
 0x395   : > { %v1044_v12 = vrot.slane %v2914_v9, %v1043_v4  ;;  %v1355_v9 = vld [vmem:[#allocation10] sm:$0xff] }
 0x401   : > { %v2920_v13 = vpop.permute.xlu1 %1015  ;;  %v1012_v14 = vpop.permute.xlu0 %1011 }
 0x402   : > { %v1027_v15 = vsel %vm559_vm4, %v1004_v58, %v1012_v14  ;;  %v1028_v16 = vsel %vm530_vm3, %v1012_v14, %v2920_v13  ;;  %v2038_v58 = vpack.c.bf16 %v1127_v55, %v1126_v54  ;;  %v2046_v14 = vpack.c.bf16 %v1131_v3, %v1130_v2  ;;  %v1453_v55 = vld [vmem:[#allocation11 + $0x50] sm:$0xff] }
 0x403   : > { %v1058_v8 = vadd.f32 %v1036_v10, %v1027_v15  ;;  %v1059_v20 = vadd.f32 %v1040_v11, %v1028_v16  ;;  %v2044_v11 = vpack.c.bf16 %v1113_v7, %v1112_v1  ;;  %v1114_v15 = vld [vmem:[#allocation8 + $0x170] sm:$0xff]  ;;  %v1115_v16 = vld [vmem:[#allocation8 + $0x178] sm:$0xff]  ;;  %v2099_v54 = vpack.c.bf16 %v1452_v53, %v1451_v52  ;;  %v1140_v7 = vld [vmem:[%s3016_s6] sm:$0x1] }
 0x404   : > { %v2048_v6 = vpack.c.bf16 %v1115_v16, %v1114_v15  ;;  %v1458_v16 = vld [vmem:[#allocation11 + $0x78] sm:$0xff] }
 0x405   : > { %v1063_v24 = vmax.f32 %v1058_v8, 0.0  ;;  %v1064_v25 = vmax.f32 %v1059_v20, 0.0  ;;  %v1025_v26 = vpop.permute.xlu0 %1024  ;;  %v1020_v10 = vpop.permute.xlu1 %1019  ;;  %v1356_v8 = vld [vmem:[#allocation10 + $0x8] sm:$0xff]  ;;  %v1357_v20 = vld [vmem:[#allocation10 + $0x10] sm:$0xff] }
 0x406   : > { %v1030_v28 = vsel %vm559_vm4, %v1008_v63, %v1025_v26  ;;  %v1062_v29 = vadd.f32 %v1052_v17, %v1025_v26  ;;  %v2040_v63 = vpack.c.bf16 %v1111_v60, %v1110_v59  ;;  %v1029_v17 = vsel %vm525_vm2, %v2920_v13, %v1020_v10  ;;  %v1359_v13 = vld [vmem:[#allocation10 + $0x20] sm:$0xff]  ;;  %v1361_v26 = vld [vmem:[#allocation10 + $0x30] sm:$0xff]  ;;  %v1456_v60 = vld [vmem:[#allocation11 + $0x68] sm:$0xff] }
 0x407   : > { %v1061_v33 = vadd.f32 %v1048_v21, %v1030_v28  ;;  %1208 = vmatprep.mubr.f32.mxu0 %v1064_v25  ;;  %v1060_v18 = vadd.f32 %v1044_v12, %v1029_v17  ;;  %v2063_v21 = vpack.c.bf16 %v1356_v8, %v1355_v9  ;;  %v2066_v23 = vpack.c.bf16 %v1358_v22, %v1357_v20  ;;  %v1455_v59 = vld [vmem:[#allocation11 + $0x60] sm:$0xff] }
 0x408   : > { %v1067_v36 = vmax.f32 %v1062_v29, 0.0  ;;  %1209 = vmatmul.mubr.f32.vlgmr.msra.gmra.mrb[8].mxu0 %v1063_v24  ;;  %v1360_v24 = vld [vmem:[#allocation10 + $0x28] sm:$0xff]  ;;  %v2105_v61 = vpack.c.bf16 %v1456_v60, %v1455_v59  ;;  %v1459_v20 = vld [vmem:[%s3059_s11] sm:$0x1] }
 0x409   : > { %v1066_v37 = vmax.f32 %v1061_v33, 0.0  ;;  %2021 = vmatpush3.bf16.msra.mxu0 %v2020_v27  ;;  %v1065_v19 = vmax.f32 %v1060_v18, 0.0  ;;  %v2069_v25 = vpack.c.bf16 %v1360_v24, %v1359_v13  ;;  %v1362_v27 = vld [vmem:[#allocation10 + $0x38] sm:$0xff]  ;;  %v1364_v29 = vld [vmem:[#allocation10 + $0x48] sm:$0xff]  ;;  %v2078_v33 = vpack.c.bf16 %v1366_v32, %v1365_v31 }
 0x40a   : > { %1820 = vmatmul.mubr.msk.f32.vlgmr.msra.gmra.mrb[4].mxu1 %vm530_vm3, %v1067_v36  ;;  %2023 = vmatprep.subr.bf16.mxu0 %v2022_v30  ;;  %v2072_v28 = vpack.c.bf16 %v1362_v27, %v1361_v26  ;;  %v2081_v36 = vpack.c.bf16 %v1368_v35, %v1367_v34 }
 0x40b   : > { %1278 = vmatprep.mubr.f32.mxu0 %v1066_v37  ;;  %1889 = vmatprep.mubr.msk.f32.mxu1 %vm2491_vm15, %v2484_v0  ;;  %v1369_v37 = vld [vmem:[#allocation10 + $0x70] sm:$0xff] }
 0x40c   : > { %2088 = vmatpush3.bf16.msra.mxu1 %v2087_v43 }
 0x40d   : > { %2025 = vmatpush3.bf16.msra.mxu0 %v2024_v38  ;;  %v1370_v38 = vld [vmem:[#allocation10 + $0x78] sm:$0xff]  ;;  %2089 = vmatprep.subr.bf16.mxu1 %v2490_v57 }
 0x40e   : > { %2027 = vmatprep.subr.bf16.mxu0 %v2026_v39  ;;  %v2084_v39 = vpack.c.bf16 %v1370_v38, %v1369_v37 }
 0x411   : > { %2029 = vmatpush3.bf16.msra.mxu0 %v2028_v44  ;;  %v1446_v44 = vld [vmem:[#allocation11 + $0x18] sm:$0xff] }
 0x412   : > { %2031 = vmatprep.subr.bf16.mxu0 %v2030_v45  ;;  %v2090_v45 = vpack.c.bf16 %v1446_v44, %v1445_v42 }
 0x414   : > { %2091 = vmatpush3.bf16.msra.mxu1 %v2090_v45 }
 0x415   : > { %2033 = vmatpush3.bf16.msra.mxu0 %v2032_v50  ;;  %2092 = vmatprep.subr.bf16.mxu1 %v2490_v57  ;;  %v1450_v50 = vld [vmem:[#allocation11 + $0x38] sm:$0xff] }
 0x416   : > { %2035 = vmatprep.subr.bf16.mxu0 %v2034_v51  ;;  %v2096_v51 = vpack.c.bf16 %v1450_v50, %v1449_v49 }
 0x418   : > { %2094 = vmatpush3.bf16.msra.mxu1 %v2093_v48 }
 0x419   : > { %2037 = vmatpush3.bf16.msra.mxu0 %v2036_v56  ;;  %2095 = vmatprep.subr.bf16.mxu1 %v2490_v57  ;;  %v1454_v56 = vld [vmem:[#allocation11 + $0x58] sm:$0xff] }
 0x41a   : > { %2039 = vmatprep.subr.bf16.mxu0 %v2038_v58  ;;  %v2102_v58 = vpack.c.bf16 %v1454_v56, %v1453_v55 }
 0x41c   : > { %2097 = vmatpush3.bf16.msra.mxu1 %v2096_v51 }
 0x41d   : > { %2041 = vmatpush3.bf16.msra.mxu0 %v2040_v63  ;;  %2098 = vmatprep.subr.bf16.mxu1 %v2490_v57 }
 0x41e   : > { %2043 = vmatprep.subr.bf16.mxu0 %v2042_v5 }
 0x420   : > { %2100 = vmatpush3.bf16.msra.mxu1 %v2099_v54 }
 0x421   : > { %2045 = vmatpush3.bf16.msra.mxu0 %v2044_v11  ;;  %2101 = vmatprep.subr.bf16.mxu1 %v2490_v57 }
 0x422   : > { %2047 = vmatprep.subr.bf16.mxu0 %v2046_v14 }
 0x424   : > { %2103 = vmatpush3.bf16.msra.mxu1 %v2102_v58 }
 0x425   : > { %2049 = vmatpush3.bf16.msra.mxu0 %v2048_v6  ;;  %2104 = vmatprep.subr.bf16.mxu1 %v2490_v57  ;;  %v1371_v6 = vld [vmem:[%s3058_s14] sm:$0x1]  ;;  %s2400_s14 = scalar_lea.vmem %s2399_s29, 32 }
 0x426   : > { %2062 = vmatprep.subr.bf16.mxu0 %v2490_v57  ;;  %p2402_p12 = scmp.lt.s32.totalorder %s2400_s14, %s2394_s10 }
 0x428   : > { %1279 = vmatmul.mubr.f32.vlgmr.msra.gmra.mrb[10].mxu0 %v1065_v19  ;;  %2106 = vmatpush3.bf16.msra.mxu1 %v2105_v61  ;;  %p2403_p13 = por %p2402_p12, %p2401_p11 }
 0x429   : > { %1854 = vmatprep.mubr.msk.f32.mxu0 %vm2491_vm15, %v2484_v0  ;;  %2064 = vmatpush3.bf16.msra.mxu0 %v2063_v21  ;;  %v1363_v0 = vld [vmem:[#allocation10 + $0x40] sm:$0xff] }
 0x42a   : > { %2065 = vmatprep.subr.bf16.mxu0 %v2490_v57  ;;  %v2075_v30 = vpack.c.bf16 %v1364_v29, %v1363_v0  ;;  %2107 = vmatprep.subr.bf16.mxu1 %v2490_v57  ;;  %p2404_p8 = pnand %p2403_p13, %p2397_p1 }
 0x42d   : > { %2067 = vmatpush3.bf16.msra.mxu0 %v2066_v23 }
 0x42e   : > { %2068 = vmatprep.subr.bf16.mxu0 %v2490_v57 }
 0x431   : > { %2070 = vmatpush3.bf16.msra.mxu0 %v2069_v25 }
 0x432   : > { %2071 = vmatprep.subr.bf16.mxu0 %v2490_v57 }
 0x435   : > { %2073 = vmatpush3.bf16.msra.mxu0 %v2072_v28 }
 0x436   : > { %2074 = vmatprep.subr.bf16.mxu0 %v2490_v57 }
 0x439   : > { %2076 = vmatpush3.bf16.msra.mxu0 %v2075_v30 }
 0x43a   : > { %2077 = vmatprep.subr.bf16.mxu0 %v2490_v57 }
 0x43d   : > { %2079 = vmatpush3.bf16.msra.mxu0 %v2078_v33 }
 0x43e   : > { %2080 = vmatprep.subr.bf16.mxu0 %v2490_v57 }
 0x441   : > { %2082 = vmatpush3.bf16.msra.mxu0 %v2081_v36 }
 0x442   : > { %2083 = vmatprep.subr.bf16.mxu0 %v2490_v57  ;;  %v1457_v57 = vld [vmem:[#allocation11 + $0x70] sm:$0xff] }
 0x443   : > { %v2108_v17 = vpack.c.bf16 %v1458_v16, %v1457_v57 }
 0x445   : > { %2085 = vmatpush3.bf16.msra.mxu0 %v2084_v39  ;;  %2109 = vmatpush3.bf16.msra.mxu1 %v2108_v17 }
 0x4db   : > { %v1722_v62 = vpop.f32.mrb[8].mxu0 }
 0x4dc   : > { %v1723_v63 = vpop.f32.mrb[9].mxu0 }
 0x4dd   : > { %v1724_v4 = vadd.f32 %v1723_v63, %v1722_v62  ;;  %v1350_v5 = vpop.f32.mrb[4].mxu1 }
 0x4de   : > { %v1821_v1 = vpop.f32.mrb[5].mxu1 }
 0x4df   : > { %v1211_v10 = vadd.f32 %v1724_v4, %v1140_v7 }
 0x4fb   : > { %v1757_v2 = vpop.f32.mrb[10].mxu0 }
 0x4fc   : > { %v1758_v3 = vpop.f32.mrb[11].mxu0 }
 0x4fd   : > { %v1759_v11 = vadd.f32 %v1758_v3, %v1757_v2 }
 0x4ff   : > { %v1281_v12 = vadd.f32 %v1759_v11, %v1211_v10 }
 0x501   : > { %v1351_v14 = vadd.f32 %v1350_v5, %v1281_v12 }
 0x503   : > { %v1354_v15 = vmax.f32 %v1351_v14, 0.0 }
 0x505   : > { %1855 = vmatmul.mubr.f32.vlgmr.msra.gmra.mrb[12].mxu0 %v1354_v15 }
 0x5d8   : > { %v1438_v18 = vpop.f32.mrb[12].mxu0 }
 0x5d9   : > { %v1439_v19 = vadd.f32 %v1438_v18, %v1371_v6  ;;  %v1856_v9 = vpop.f32.mrb[13].mxu0 }
 0x5db   : > { %v1442_v8 = vmax.f32 %v1439_v19, 0.0 }
 0x5dd   : > { %1890 = vmatmul.mubr.f32.vlgmr.msra.gmra.mrb[6].mxu1 %v1442_v8 }
 0x6b0   : > { %v1526_v21 = vpop.f32.mrb[6].mxu1 }
 0x6b1   : > { %v1527_v22 = vadd.f32 %v1526_v21, %v1459_v20  ;;  %v1891_v23 = vpop.f32.mrb[7].mxu1 }
 0x6b3   : > { %1530 = vst [vmem:[%s476_s15] sm:$0x1] %v1527_v22 }
 0x6b4   : > { %2407 = shalt.err (!%p2404_p8)
}
 0x6b5   : > { %s2408_s3 = scalar_lea.hbm %s2966_s22, 16  ;;  %s2412_s11 = scalar_lea.hbm %s3060_s28, 32 }
 0x6b6   : > { %p2409_p6 = scmp.ne.s32.totalorder %s2966_s22, %s2408_s3  ;;  %p2413_p3 = scmp.lt.u32.totalorder %s2966_s22, %s3060_s28 }
 0x6b7   : > { %p2414_p0 = scmp.lt.u32.totalorder %s2412_s11, %s2408_s3  ;;  %p2416_p2 = scmp.lt.u32.totalorder %s2408_s3, %s2966_s22 }
 0x6b8   : > { %p2410_p9 = pnand %p2409_p6, %p3061_p7 }
 0x6b9   : > { %p2415_p5 = por %p2414_p0, %p2413_p3 }
 0x6ba   : > { %p2411_p4 = pneg %p2410_p9 }
 0x6bb   : > { %p2417_p10 = por %p2416_p2, %p2415_p5 }
 0x6bd   : > { %p2418_p1 = pnand %p2417_p10, %p2411_p4 }
 0x6bf   : > { %2421 = shalt.err (!%p2418_p1)
}
 0x6c0   : > { %2136 = dma.vmem_to_hbm [thread:$0]  (%p3061_p7), %s2968_s1, 16, %s2966_s22, %s1532_s30  }
 0x6c1 PF: > { %s1556_s27 = sand.u32 1, %s2460_s17   ;;  %p3062_p11 = scmp.ne.s32.totalorder %s3047_s21, 0 }
 0x6c2   : > { %p3063_p12 = scmp.ge.s32.totalorder %s2472_s20, 2  ;;  %s1557_s8 = scalar_lea.sflag [#allocation4], %s1556_s27 }
 0x6c4   : > { %p2159_p13 = pnand %p3063_p12, %p3062_p11 }
 0x6c6   : > { %2455 = dma.done.wait (!%p2159_p13), %s1557_s8, 16  }
 0x6c7   : > { %2457 = vsyncadd (!%p2159_p13), %s1557_s8, 4294967280  ;;  %p27_p8 = scmp.ge.s32.totalorder %s2723_s16, 4   ;;  %s3064_s17 = smov %s2464_s18 }
 0x6c8   : > { %s3065_s18 = smov %s2468_s19  ;;  %s3066_s19 = smov %s2735_s26 }
 0x6c9   : > { %s3067_s20 = smov %s2723_s16  ;;  %29 = sbr.rel (!%p27_p8) target bundleno = 14 (0xe), region = 129 }
 0x6d0   :  { %1561 = vsyncpa [#allocation3], 1 }
 0x6d1   :  { %1563 = vsyncpa [#allocation3 + $0x1], 1 }
 0x6d2   :  { %1564 = vsyncpa [#allocation6], 1 }
 0x6d3   :  { %1565 = vsyncpa [#allocation9], 1 }
 0x6d4   :  { %1566 = vsyncpa [#allocation12], 1 }
 0x6d5   :  { %1567 = vsyncpa [#allocation4], 1 }
 0x6d6   :  { %1569 = vsyncpa [#allocation4 + $0x1], 1 }

</bundles_post_ra>
